<compile_context>
chip_gen: v6e
topology: v6e:2x2x1
jax: 0.10.0
libtpu: 0.0.40
codegen_flags: <defaults>
</compile_context>

<pallas_src>
import math

import jax
import jax.numpy as jnp
from jax.experimental import pallas as pl
from jax.experimental.pallas import tpu as pltpu


def _make_mha_kernel(head_num, head_dim, seq_len, block_b, compute_dtype):
    H, hd, S, Bt = head_num, head_dim, seq_len, block_b
    F = H * hd
    rows = Bt * S

    def kernel(q_ref, k_ref, v_ref,
               wq_ref, bq_ref, wk_ref, bk_ref, wv_ref, bv_ref,
               wo_ref, bo_ref, o_ref):

        def proj_relu(x_ref, w_ref, b_ref):
            # Load f32 once from the pipeline buffer, cast to the MXU dtype on
            # the VPU (no separate wrapper cast pass over HBM), then a single
            # (rows, F) x (F, F) matmul with f32 accumulation; bias + ReLU f32.
            x = x_ref[...].astype(compute_dtype)
            y = jnp.dot(x, w_ref[...], preferred_element_type=jnp.float32)
            return jnp.maximum(y + b_ref[...], 0.0)        # f32 (rows, F)

        # 1/sqrt(head_dim) is folded into wq/bq at prep time (ReLU commutes
        # with a positive scale), so the scores below need no extra scaling.
        q_act = proj_relu(q_ref, wq_ref, bq_ref)
        k_act = proj_relu(k_ref, wk_ref, bk_ref)
        v_act = proj_relu(v_ref, wv_ref, bv_ref)

        def to_heads(x2):
            # Single fused relayout (no per-head lane slices, no stack):
            #   (rows, F) -> (rows, H, hd) -> (H, rows, hd) -> (H*Bt, S, hd)
            # Relayout in f32 (widest/cheapest layout support), cast to the
            # MXU dtype afterwards.
            xh = jnp.transpose(x2.reshape(rows, H, hd), (1, 0, 2))
            return xh.reshape(H * Bt, S, hd).astype(compute_dtype)

        q_h = to_heads(q_act)          # (H*Bt, S, hd)
        k_h = to_heads(k_act)
        v_h = to_heads(v_act)

        # Scores for every (head, batch) pair in ONE batched MXU contraction.
        s = jnp.einsum('bqd,bkd->bqk', q_h, k_h,
                       preferred_element_type=jnp.float32)  # (H*Bt, S, S) f32
        # TODO(synk): optional attention mask (masked_fill) not wired in; this
        # matches forward(..., mask=None).
        # TODO(synk): for large S, tile the KV axis with an online softmax
        # (flash pattern) instead of materializing the (H*Bt, S, S) scores.
        m = jnp.max(s, axis=-1, keepdims=True)
        e = jnp.exp(s - m)             # f32 softmax path (v5e has no bf16 EUP)
        # TODO(synk): on v6e/v7x (bf16 VPU/EUP) the exp/prob tensor could be
        # computed in bf16 to halve EUP/VALU vreg traffic.
        denom = jnp.sum(e, axis=-1, keepdims=True)
        p = (e * pl.reciprocal(denom, approx=True)).astype(compute_dtype)

        ctx = jnp.einsum('bqk,bkd->bqd', p, v_h,
                         preferred_element_type=jnp.float32)  # (H*Bt, S, hd)

        # Merge heads back into a lane-dense (rows, F) slab (feature order
        # h*hd + d, matching Wo's input ordering) and fuse the head merge into
        # ONE (rows, F) x (F, F) output projection — no (H, rows, F) temporary
        # and no cross-head VPU reduce.
        ctx = jnp.transpose(ctx.reshape(H, rows, hd), (1, 0, 2))
        ctx = ctx.reshape(rows, F).astype(compute_dtype)
        out = jnp.dot(ctx, wo_ref[...], preferred_element_type=jnp.float32)
        out = jnp.maximum(out + bo_ref[...], 0.0)
        o_ref[...] = out.astype(o_ref.dtype)

    return kernel


def prepare_params(params, head_num, compute_dtype=jnp.bfloat16):
    """One-time torch->(in,out) transpose, scale fold into Wq/bq, dtype cast."""
    in_features = params["wq"].shape[0]
    head_dim = in_features // head_num
    scale = 1.0 / math.sqrt(head_dim)
    f32 = jnp.float32
    return {
        "wq": (params["wq"].T * scale).astype(compute_dtype),
        "bq": (params["bq"] * scale).reshape(1, in_features).astype(f32),
        "wk": params["wk"].T.astype(compute_dtype),
        "bk": params["bk"].reshape(1, in_features).astype(f32),
        "wv": params["wv"].T.astype(compute_dtype),
        "bv": params["bv"].reshape(1, in_features).astype(f32),
        # Plain (in=F, out=F): the head merge is a single matmul in-kernel.
        "wo": params["wo"].T.astype(compute_dtype),
        "bo": params["bo"].reshape(1, in_features).astype(f32),
    }


def _pick_block_b(B, S, F, head_num, vmem_budget_bytes=16 * 1024 * 1024):
    """Batch-tile heuristic.

    Goals (perf review):
      * rows = block_b*S near 512 (fills the MXU M dim on v6e/v7x; 128+ is
        enough on v5e) and amortizes the ~0.35us per-grid-step overhead,
      * >= 2 grid steps whenever B allows, so dimension_semantics=("parallel",)
        can shard the grid across v7x's 2 TensorCores,
      * per-step VMEM footprint <= ~half of the 32 MiB scoped limit we request
        (safe on v5e/v6e 128 MiB and v7x 64 MiB physical VMEM).
    """
    hd = F // head_num

    def footprint(bb):
        r = bb * S
        acts = 3 * 2 * r * F * 4                 # q/k/v f32 blocks, double-buffered
        outb = 2 * r * F * 4                     # output block (<= f32), double-buffered
        wts = 2 * (4 * F * F * 2 + 4 * F * 4)    # bf16 weights + f32 biases, x2 buffers
        heads = 2 * 3 * head_num * r * hd * 4    # head-major q/k/v copies
        attn = 3 * bb * head_num * S * S * 4     # scores + exp + probs
        ctx = 2 * r * F * 4                      # context (head-major + merged)
        return acts + outb + wts + heads + attn + ctx

    block_b = max(1, min(B, 512 // max(S, 1)))
    if B >= 2:
        block_b = min(block_b, max(1, B // 2))   # >= 2 parallel steps (v7x)
    while block_b > 1 and (B % block_b or footprint(block_b) > vmem_budget_bytes):
        block_b -= 1
    # Multi-step grids need sublane-aligned row tiles; otherwise fall back to
    # a single full-batch step (block shape == full array dims is always legal).
    if B // block_b > 1 and (block_b * S) % 8 != 0:
        block_b = B
    return block_b


def multi_head_attention(q, k, v, prepared, head_num, *,
                         block_b=None, compute_dtype=jnp.bfloat16,
                         out_dtype=None):
    """Pallas MHA matching MultiHeadAttention.forward (bias=True, relu, mask=None)."""
    B, S, F = q.shape
    assert F % head_num == 0
    head_dim = F // head_num
    if out_dtype is None:
        out_dtype = q.dtype

    if block_b is None:
        block_b = _pick_block_b(B, S, F, head_num)
    rows = block_b * S
    if B // block_b > 1:
        assert rows % 8 == 0, "row tile must be a multiple of 8 sublanes"

    # Lane-dense f32 slabs with batch folded into the matmul M dimension; the
    # bf16 cast for the MXU happens inside the kernel (one HBM read, no extra
    # wrapper cast pass).
    q2 = q.reshape(B * S, F)
    k2 = k.reshape(B * S, F)
    v2 = v.reshape(B * S, F)

    kernel = _make_mha_kernel(head_num, head_dim, S, block_b, compute_dtype)

    act_spec = pl.BlockSpec((rows, F), lambda i: (i, 0))
    w_spec = pl.BlockSpec((F, F), lambda i: (0, 0))
    b_spec = pl.BlockSpec((1, F), lambda i: (0, 0))
    # TODO(synk): at large F, mark the grid-invariant weight/bias specs
    # pipeline_mode=pl.Buffered(1) (second buffer is dead) and K-tile the
    # (F, F) weights over an extra 'arbitrary' grid axis; negligible at F=32.

    out2 = pl.pallas_call(
        kernel,
        out_shape=jax.ShapeDtypeStruct((B * S, F), out_dtype),
        grid_spec=pltpu.PrefetchScalarGridSpec(
            num_scalar_prefetch=0,
            grid=(B // block_b,),
            in_specs=[act_spec, act_spec, act_spec,
                      w_spec, b_spec, w_spec, b_spec, w_spec, b_spec,
                      w_spec, b_spec],
            out_specs=act_spec,
        ),
        compiler_params=pltpu.CompilerParams(
            dimension_semantics=("parallel",),
            vmem_limit_bytes=32 * 1024 * 1024),
    )(q2, k2, v2,
      prepared["wq"], prepared["bq"], prepared["wk"], prepared["bk"],
      prepared["wv"], prepared["bv"], prepared["wo"], prepared["bo"])

    return out2.reshape(B, S, F)


def _reference(q, k, v, params, head_num):
    """Pure-JAX f32 mirror of the PyTorch forward (mask=None)."""
    B, S, F = q.shape
    hd = F // head_num

    def lin_relu(x, w, b):
        return jnp.maximum(x @ w.T + b, 0.0)

    qp = lin_relu(q, params["wq"], params["bq"])
    kp = lin_relu(k, params["wk"], params["bk"])
    vp = lin_relu(v, params["wv"], params["bv"])

    def to_heads(x):
        return x.reshape(B, S, head_num, hd).transpose(0, 2, 1, 3)

    qh, kh, vh = to_heads(qp), to_heads(kp), to_heads(vp)
    scores = jnp.einsum("bhqd,bhkd->bhqk", qh, kh) / math.sqrt(hd)
    attn = jax.nn.softmax(scores, axis=-1)
    ctx = jnp.einsum("bhqk,bhkd->bhqd", attn, vh)
    ctx = ctx.transpose(0, 2, 1, 3).reshape(B, S, F)
    return jnp.maximum(ctx @ params["wo"].T + params["bo"], 0.0)


if __name__ == "__main__":
    B, S, F, H = 4, 8, 32, 4

    key = jax.random.PRNGKey(0)
    keys = jax.random.split(key, 11)

    q = jax.random.normal(keys[0], (B, S, F), jnp.float32)
    k = jax.random.normal(keys[1], (B, S, F), jnp.float32)
    v = jax.random.normal(keys[2], (B, S, F), jnp.float32)

    bound = 1.0 / math.sqrt(F)  # torch nn.Linear default init range
    params = {
        "wq": jax.random.uniform(keys[3], (F, F), jnp.float32, -bound, bound),
        "bq": jax.random.uniform(keys[4], (F,), jnp.float32, -bound, bound),
        "wk": jax.random.uniform(keys[5], (F, F), jnp.float32, -bound, bound),
        "bk": jax.random.uniform(keys[6], (F,), jnp.float32, -bound, bound),
        "wv": jax.random.uniform(keys[7], (F, F), jnp.float32, -bound, bound),
        "bv": jax.random.uniform(keys[8], (F,), jnp.float32, -bound, bound),
        "wo": jax.random.uniform(keys[9], (F, F), jnp.float32, -bound, bound),
        "bo": jax.random.uniform(keys[10], (F,), jnp.float32, -bound, bound),
    }

    prepared = prepare_params(params, H)          # one-time weight prep
    out = multi_head_attention(q, k, v, prepared, H, out_dtype=jnp.bfloat16)
    out = jax.block_until_ready(out)

    ref = _reference(q, k, v, params, H)
    assert out.shape == (B, S, F)
    assert out.dtype == jnp.bfloat16
    # bf16 MXU operands + bf16 output + approximate softmax reciprocal ->
    # looser tolerance than a pure-f32 comparison.
    assert jnp.allclose(out.astype(jnp.float32), ref, atol=3e-2, rtol=3e-2), \
        "mismatch vs reference"

    print("KERNEL_OK")
</pallas_src>

<mosaic_0001>
module attributes {stable_mosaic.version = 11 : i64} {
  func.func @kernel(%arg0: i32, %arg1: memref<16x32xf32, #tpu.memory_space<vmem>>, %arg2: memref<16x32xf32, #tpu.memory_space<vmem>>, %arg3: memref<16x32xf32, #tpu.memory_space<vmem>>, %arg4: memref<32x32xbf16, #tpu.memory_space<vmem>>, %arg5: memref<1x32xf32, #tpu.memory_space<vmem>>, %arg6: memref<32x32xbf16, #tpu.memory_space<vmem>>, %arg7: memref<1x32xf32, #tpu.memory_space<vmem>>, %arg8: memref<32x32xbf16, #tpu.memory_space<vmem>>, %arg9: memref<1x32xf32, #tpu.memory_space<vmem>>, %arg10: memref<32x32xbf16, #tpu.memory_space<vmem>>, %arg11: memref<1x32xf32, #tpu.memory_space<vmem>>, %arg12: memref<16x32xbf16, #tpu.memory_space<vmem>>) attributes {dimension_semantics = [#tpu.dimension_semantics<parallel>], iteration_bounds = array<i64: 2>, scalar_prefetch = 0 : i64, scratch_operands = 0 : i64, tpu.core_type = #tpu.core_type<tc>, window_params = [{transform_indices = @transform_0, window_bounds = array<i64: 16, 32>}, {transform_indices = @transform_1, window_bounds = array<i64: 16, 32>}, {transform_indices = @transform_2, window_bounds = array<i64: 16, 32>}, {pipeline_mode = #tpu.pipeline_mode<synchronous>, transform_indices = @transform_3, window_bounds = array<i64: 32, 32>}, {pipeline_mode = #tpu.pipeline_mode<synchronous>, transform_indices = @transform_4, window_bounds = array<i64: 1, 32>}, {pipeline_mode = #tpu.pipeline_mode<synchronous>, transform_indices = @transform_5, window_bounds = array<i64: 32, 32>}, {pipeline_mode = #tpu.pipeline_mode<synchronous>, transform_indices = @transform_6, window_bounds = array<i64: 1, 32>}, {pipeline_mode = #tpu.pipeline_mode<synchronous>, transform_indices = @transform_7, window_bounds = array<i64: 32, 32>}, {pipeline_mode = #tpu.pipeline_mode<synchronous>, transform_indices = @transform_8, window_bounds = array<i64: 1, 32>}, {pipeline_mode = #tpu.pipeline_mode<synchronous>, transform_indices = @transform_9, window_bounds = array<i64: 32, 32>}, {pipeline_mode = #tpu.pipeline_mode<synchronous>, transform_indices = @transform_10, window_bounds = array<i64: 1, 32>}, {transform_indices = @transform_11, window_bounds = array<i64: 16, 32>}]} {
    %c0 = arith.constant 0 : index
    %c0_0 = arith.constant 0 : index
    %0 = vector.load %arg1[%c0, %c0_0] : memref<16x32xf32, #tpu.memory_space<vmem>>, vector<16x32xf32>
    %1 = arith.truncf %0 : vector<16x32xf32> to vector<16x32xbf16>
    %c0_1 = arith.constant 0 : index
    %c0_2 = arith.constant 0 : index
    %2 = vector.load %arg4[%c0_1, %c0_2] : memref<32x32xbf16, #tpu.memory_space<vmem>>, vector<32x32xbf16>
    %cst = arith.constant dense<0.000000e+00> : vector<16x32xf32>
    %3 = tpu.matmul %1, %2, %cst {dimension_numbers = #tpu.dot_dimension_numbers<[1], [0], [0], [1], [0, 0, 1, 1], [], []>} : vector<16x32xbf16>, vector<32x32xbf16>, vector<16x32xf32> -> vector<16x32xf32>
    %c0_3 = arith.constant 0 : index
    %c0_4 = arith.constant 0 : index
    %4 = vector.load %arg5[%c0_3, %c0_4] : memref<1x32xf32, #tpu.memory_space<vmem>>, vector<1x32xf32>
    %5 = vector.broadcast %4 : vector<1x32xf32> to vector<16x32xf32>
    %6 = arith.addf %3, %5 : vector<16x32xf32>
    %cst_5 = arith.constant 0.000000e+00 : f32
    %7 = vector.broadcast %cst_5 : f32 to vector<16x32xf32>
    %8 = arith.maximumf %6, %7 : vector<16x32xf32>
    %c0_6 = arith.constant 0 : index
    %c0_7 = arith.constant 0 : index
    %9 = vector.load %arg2[%c0_6, %c0_7] : memref<16x32xf32, #tpu.memory_space<vmem>>, vector<16x32xf32>
    %10 = arith.truncf %9 : vector<16x32xf32> to vector<16x32xbf16>
    %c0_8 = arith.constant 0 : index
    %c0_9 = arith.constant 0 : index
    %11 = vector.load %arg6[%c0_8, %c0_9] : memref<32x32xbf16, #tpu.memory_space<vmem>>, vector<32x32xbf16>
    %cst_10 = arith.constant dense<0.000000e+00> : vector<16x32xf32>
    %12 = tpu.matmul %10, %11, %cst_10 {dimension_numbers = #tpu.dot_dimension_numbers<[1], [0], [0], [1], [0, 0, 1, 1], [], []>} : vector<16x32xbf16>, vector<32x32xbf16>, vector<16x32xf32> -> vector<16x32xf32>
    %c0_11 = arith.constant 0 : index
    %c0_12 = arith.constant 0 : index
    %13 = vector.load %arg7[%c0_11, %c0_12] : memref<1x32xf32, #tpu.memory_space<vmem>>, vector<1x32xf32>
    %14 = vector.broadcast %13 : vector<1x32xf32> to vector<16x32xf32>
    %15 = arith.addf %12, %14 : vector<16x32xf32>
    %cst_13 = arith.constant 0.000000e+00 : f32
    %16 = vector.broadcast %cst_13 : f32 to vector<16x32xf32>
    %17 = arith.maximumf %15, %16 : vector<16x32xf32>
    %c0_14 = arith.constant 0 : index
    %c0_15 = arith.constant 0 : index
    %18 = vector.load %arg3[%c0_14, %c0_15] : memref<16x32xf32, #tpu.memory_space<vmem>>, vector<16x32xf32>
    %19 = arith.truncf %18 : vector<16x32xf32> to vector<16x32xbf16>
    %c0_16 = arith.constant 0 : index
    %c0_17 = arith.constant 0 : index
    %20 = vector.load %arg8[%c0_16, %c0_17] : memref<32x32xbf16, #tpu.memory_space<vmem>>, vector<32x32xbf16>
    %cst_18 = arith.constant dense<0.000000e+00> : vector<16x32xf32>
    %21 = tpu.matmul %19, %20, %cst_18 {dimension_numbers = #tpu.dot_dimension_numbers<[1], [0], [0], [1], [0, 0, 1, 1], [], []>} : vector<16x32xbf16>, vector<32x32xbf16>, vector<16x32xf32> -> vector<16x32xf32>
    %c0_19 = arith.constant 0 : index
    %c0_20 = arith.constant 0 : index
    %22 = vector.load %arg9[%c0_19, %c0_20] : memref<1x32xf32, #tpu.memory_space<vmem>>, vector<1x32xf32>
    %23 = vector.broadcast %22 : vector<1x32xf32> to vector<16x32xf32>
    %24 = arith.addf %21, %23 : vector<16x32xf32>
    %cst_21 = arith.constant 0.000000e+00 : f32
    %25 = vector.broadcast %cst_21 : f32 to vector<16x32xf32>
    %26 = arith.maximumf %24, %25 : vector<16x32xf32>
    %27 = vector.shape_cast %8 : vector<16x32xf32> to vector<16x4x8xf32>
    %28 = tpu.transpose %27, [1, 0, 2] : vector<16x4x8xf32> -> vector<4x16x8xf32>
    %29 = vector.shape_cast %28 : vector<4x16x8xf32> to vector<8x8x8xf32>
    %30 = arith.truncf %29 : vector<8x8x8xf32> to vector<8x8x8xbf16>
    %31 = vector.shape_cast %17 : vector<16x32xf32> to vector<16x4x8xf32>
    %32 = tpu.transpose %31, [1, 0, 2] : vector<16x4x8xf32> -> vector<4x16x8xf32>
    %33 = vector.shape_cast %32 : vector<4x16x8xf32> to vector<8x8x8xf32>
    %34 = arith.truncf %33 : vector<8x8x8xf32> to vector<8x8x8xbf16>
    %35 = vector.shape_cast %26 : vector<16x32xf32> to vector<16x4x8xf32>
    %36 = tpu.transpose %35, [1, 0, 2] : vector<16x4x8xf32> -> vector<4x16x8xf32>
    %37 = vector.shape_cast %36 : vector<4x16x8xf32> to vector<8x8x8xf32>
    %38 = arith.truncf %37 : vector<8x8x8xf32> to vector<8x8x8xbf16>
    "tpu.trace_start"() <{level = 10 : i32, message = "bqd,bkd->bqk"}> : () -> ()
    %cst_22 = arith.constant dense<0.000000e+00> : vector<8x8x8xf32>
    %39 = tpu.matmul %30, %34, %cst_22 {dimension_numbers = #tpu.dot_dimension_numbers<[2], [2], [1], [1], [0, 0, 0, 1, 1, 1], [0], [0]>} : vector<8x8x8xbf16>, vector<8x8x8xbf16>, vector<8x8x8xf32> -> vector<8x8x8xf32>
    "tpu.trace_stop"() : () -> ()
    %cst_23 = arith.constant dense<0xFF800000> : vector<8x8xf32>
    %40 = vector.multi_reduction <maximumf>, %39, %cst_23 [2] : vector<8x8x8xf32> to vector<8x8xf32>
    %41 = vector.shape_cast %40 : vector<8x8xf32> to vector<8x8x1xf32>
    %42 = vector.broadcast %41 : vector<8x8x1xf32> to vector<8x8x8xf32>
    %43 = arith.subf %39, %42 : vector<8x8x8xf32>
    %44 = math.exp %43 : vector<8x8x8xf32>
    %cst_24 = arith.constant dense<0.000000e+00> : vector<8x8xf32>
    %45 = vector.multi_reduction <add>, %44, %cst_24 [2] : vector<8x8x8xf32> to vector<8x8xf32>
    %46 = vector.shape_cast %45 : vector<8x8xf32> to vector<8x8x1xf32>
    %47 = tpu.reciprocal %46 {approx = true} : vector<8x8x1xf32> -> vector<8x8x1xf32>
    %48 = vector.broadcast %47 : vector<8x8x1xf32> to vector<8x8x8xf32>
    %49 = arith.mulf %44, %48 : vector<8x8x8xf32>
    %50 = arith.truncf %49 : vector<8x8x8xf32> to vector<8x8x8xbf16>
    "tpu.trace_start"() <{level = 10 : i32, message = "bqk,bkd->bqd"}> : () -> ()
    %cst_25 = arith.constant dense<0.000000e+00> : vector<8x8x8xf32>
    %51 = tpu.matmul %50, %38, %cst_25 {dimension_numbers = #tpu.dot_dimension_numbers<[2], [1], [1], [2], [0, 0, 0, 1, 1, 2], [0], [0]>} : vector<8x8x8xbf16>, vector<8x8x8xbf16>, vector<8x8x8xf32> -> vector<8x8x8xf32>
    "tpu.trace_stop"() : () -> ()
    %52 = vector.shape_cast %51 : vector<8x8x8xf32> to vector<4x16x8xf32>
    %53 = tpu.transpose %52, [1, 0, 2] : vector<4x16x8xf32> -> vector<16x4x8xf32>
    %54 = vector.shape_cast %53 : vector<16x4x8xf32> to vector<16x32xf32>
    %55 = arith.truncf %54 : vector<16x32xf32> to vector<16x32xbf16>
    %c0_26 = arith.constant 0 : index
    %c0_27 = arith.constant 0 : index
    %56 = vector.load %arg10[%c0_26, %c0_27] : memref<32x32xbf16, #tpu.memory_space<vmem>>, vector<32x32xbf16>
    %cst_28 = arith.constant dense<0.000000e+00> : vector<16x32xf32>
    %57 = tpu.matmul %55, %56, %cst_28 {dimension_numbers = #tpu.dot_dimension_numbers<[1], [0], [0], [1], [0, 0, 1, 1], [], []>} : vector<16x32xbf16>, vector<32x32xbf16>, vector<16x32xf32> -> vector<16x32xf32>
    %c0_29 = arith.constant 0 : index
    %c0_30 = arith.constant 0 : index
    %58 = vector.load %arg11[%c0_29, %c0_30] : memref<1x32xf32, #tpu.memory_space<vmem>>, vector<1x32xf32>
    %59 = vector.broadcast %58 : vector<1x32xf32> to vector<16x32xf32>
    %60 = arith.addf %57, %59 : vector<16x32xf32>
    %cst_31 = arith.constant 0.000000e+00 : f32
    %61 = vector.broadcast %cst_31 : f32 to vector<16x32xf32>
    %62 = arith.maximumf %60, %61 : vector<16x32xf32>
    %63 = arith.truncf %62 : vector<16x32xf32> to vector<16x32xbf16>
    %c0_32 = arith.constant 0 : index
    %c0_33 = arith.constant 0 : index
    %64 = vector.load %arg12[%c0_32, %c0_33] : memref<16x32xbf16, #tpu.memory_space<vmem>>, vector<16x32xbf16>
    tpu.vector_store %arg12[%c0_32, %c0_33], %63 {strides = array<i32>} : memref<16x32xbf16, #tpu.memory_space<vmem>>, vector<16x32xbf16>,
    return
  }
  func.func @transform_0(%arg0: i32) -> (i32, i32) {
    %c0_i32 = arith.constant 0 : i32
    %c0_i32_0 = arith.constant 0 : i32
    return %arg0, %c0_i32 : i32, i32
  }
  func.func @transform_1(%arg0: i32) -> (i32, i32) {
    %c0_i32 = arith.constant 0 : i32
    %c0_i32_0 = arith.constant 0 : i32
    return %arg0, %c0_i32 : i32, i32
  }
  func.func @transform_2(%arg0: i32) -> (i32, i32) {
    %c0_i32 = arith.constant 0 : i32
    %c0_i32_0 = arith.constant 0 : i32
    return %arg0, %c0_i32 : i32, i32
  }
  func.func @transform_3(%arg0: i32) -> (i32, i32) {
    %c0_i32 = arith.constant 0 : i32
    %c0_i32_0 = arith.constant 0 : i32
    %c0_i32_1 = arith.constant 0 : i32
    return %c0_i32, %c0_i32_0 : i32, i32
  }
  func.func @transform_4(%arg0: i32) -> (i32, i32) {
    %c0_i32 = arith.constant 0 : i32
    %c0_i32_0 = arith.constant 0 : i32
    %c0_i32_1 = arith.constant 0 : i32
    return %c0_i32, %c0_i32_0 : i32, i32
  }
  func.func @transform_5(%arg0: i32) -> (i32, i32) {
    %c0_i32 = arith.constant 0 : i32
    %c0_i32_0 = arith.constant 0 : i32
    %c0_i32_1 = arith.constant 0 : i32
    return %c0_i32, %c0_i32_0 : i32, i32
  }
  func.func @transform_6(%arg0: i32) -> (i32, i32) {
    %c0_i32 = arith.constant 0 : i32
    %c0_i32_0 = arith.constant 0 : i32
    %c0_i32_1 = arith.constant 0 : i32
    return %c0_i32, %c0_i32_0 : i32, i32
  }
  func.func @transform_7(%arg0: i32) -> (i32, i32) {
    %c0_i32 = arith.constant 0 : i32
    %c0_i32_0 = arith.constant 0 : i32
    %c0_i32_1 = arith.constant 0 : i32
    return %c0_i32, %c0_i32_0 : i32, i32
  }
  func.func @transform_8(%arg0: i32) -> (i32, i32) {
    %c0_i32 = arith.constant 0 : i32
    %c0_i32_0 = arith.constant 0 : i32
    %c0_i32_1 = arith.constant 0 : i32
    return %c0_i32, %c0_i32_0 : i32, i32
  }
  func.func @transform_9(%arg0: i32) -> (i32, i32) {
    %c0_i32 = arith.constant 0 : i32
    %c0_i32_0 = arith.constant 0 : i32
    %c0_i32_1 = arith.constant 0 : i32
    return %c0_i32, %c0_i32_0 : i32, i32
  }
  func.func @transform_10(%arg0: i32) -> (i32, i32) {
    %c0_i32 = arith.constant 0 : i32
    %c0_i32_0 = arith.constant 0 : i32
    %c0_i32_1 = arith.constant 0 : i32
    return %c0_i32, %c0_i32_0 : i32, i32
  }
  func.func @transform_11(%arg0: i32) -> (i32, i32) {
    %c0_i32 = arith.constant 0 : i32
    %c0_i32_0 = arith.constant 0 : i32
    return %arg0, %c0_i32 : i32, i32
  }
}

</mosaic_0001>

<bundles_post_ra>
// kernel: tpu_custom_call.1
= control target key start
LH: loop header
LB: loop body
LE: loop exit
PB: predicated region body
PF: predicated region fallthrough
CT: control target
= control target key end

     0   :  { %s4710_s0 = inlined_call_operand.hbm [shape: f32[32,32], index: 0, kind: input, shape index: {}]   ;;  %s4711_s1 = inlined_call_operand.hbm [shape: f32[32,32], index: 1, kind: input, shape index: {}]   ;;  %s4712_s2 = inlined_call_operand.hbm [shape: f32[32,32], index: 2, kind: input, shape index: {}]   ;;  %s4713_s3 = inlined_call_operand.hbm [shape: bf16[32,32], index: 3, kind: input, shape index: {}]   ;;  %s4714_s4 = inlined_call_operand.hbm [shape: f32[1,32], index: 4, kind: input, shape index: {}]   ;;  %s4715_s5 = inlined_call_operand.hbm [shape: bf16[32,32], index: 5, kind: input, shape index: {}]   ;;  %s4716_s6 = inlined_call_operand.hbm [shape: f32[1,32], index: 6, kind: input, shape index: {}]   ;;  %s4717_s7 = inlined_call_operand.hbm [shape: bf16[32,32], index: 7, kind: input, shape index: {}]   ;;  %s4718_s8 = inlined_call_operand.hbm [shape: f32[1,32], index: 8, kind: input, shape index: {}]   ;;  %s4719_s9 = inlined_call_operand.vmem [shape: bf16[32,32], index: 9, kind: input, shape index: {}]   ;;  %s4720_s10 = inlined_call_operand.vmem [shape: f32[1,32], index: 10, kind: input, shape index: {}]   ;;  %s4721_s11 = inlined_call_operand.hbm [shape: bf16[32,32], index: 11, kind: output, shape index: {}]  }
   0x1   :  { %4739 = sst [smem:[#allocation29_spill]] %s4711_s1 }
   0x2   :  { %4740 = sst [smem:[#allocation30_spill]] %s4713_s3 }
   0x3   :  { %4741 = sst [smem:[#allocation31_spill]] %s4715_s5 }
   0x4   :  { %4742 = sst [smem:[#allocation32_spill]] %s4717_s7 }
   0x5   :  { %4743 = sst [smem:[#allocation33_spill]] %s4721_s11 }
   0x6   :  { %16 = vsyncpa [#allocation3], 0 }
   0x7   :  { %18 = vsyncpa [#allocation3 + $0x1], 0 }
   0x8   :  { %19 = vsyncpa [#allocation6], 0 }
   0x9   :  { %21 = vsyncpa [#allocation6 + $0x1], 0 }
   0xa   :  { %22 = vsyncpa [#allocation9], 0 }
   0xb   :  { %23 = vsyncpa [#allocation12], 0 }
   0xc   :  { %24 = vsyncpa [#allocation15], 0 }
   0xd   :  { %25 = vsyncpa [#allocation4], 0 }
   0xe   :  { %27 = vsyncpa [#allocation4 + $0x1], 0  ;;  %s3949_s17 = smov 0   ;;  %s3951_s18 = smov 0  }
   0xf   :  { %s3953_s19 = smov 0   ;;  %s3955_s20 = smov 0  }
  0x10 LB: > { %4744 = sst [smem:[#allocation24_spill]] %s3849_s17  ;;  %s3863_s21 = smov [#allocation8]   ;;  %s3861_s20 = sphi %s3955_s20, %s4781_s20   ;;  %s3857_s19 = sphi %s3953_s19, %s4785_s19   ;;  %s3853_s18 = sphi %s3951_s18, %s4784_s18   ;;  %s3849_s17 = sphi %s3949_s17, %s4783_s17  }
  0x11   : > { %4745 = sst [smem:[#allocation25_spill]] %s3861_s20  ;;  %s322_s22 = sshll.u32 %s3863_s21, 4  ;;  %s323_s22 = int_to_ptr.vmem [resolvable:$true] %s322_s22 }
  0x12   : > { %s3970_s23 = sadd.s32 4294967295, %s3861_s20   ;;  %p3092_p0 = scmp.ge.s32.totalorder %s3861_s20, 1 }
  0x13   : > { %p4729_p1 = scmp.eq.s32.totalorder %s3970_s23, 0  ;;  %p310_p2 = scmp.lt.s32.totalorder %s3861_s20, 3 }
  0x14   : > { %s3864_s25 = smov [#allocation11]   ;;  %s3865_s28 = smov [#allocation14]  }
  0x15   : > { %p3975_p3 = pnand %p3092_p0, %p310_p2  ;;  %s346_s26 = sshll.u32 %s3864_s25, 4  ;;  %s3988_s26 = int_to_ptr.vmem [resolvable:$true] %s346_s26 }
  0x16   : > { %s370_s29 = sshll.u32 %s3865_s28, 4  ;;  %s3552_s12 = scalar_lea.vmem %s323_s22, 256  ;;  %s3990_s29 = int_to_ptr.vmem [resolvable:$true] %s370_s29 }
  0x17   : > { %s4746_s24 = scalar_select %p3975_p3, 1, 0 }
  0x18   : > { %p3385_p5 = pneg %p3975_p3  ;;  %p3553_p8 = scmp.ne.s32.totalorder %s323_s22, %s3552_s12 }
  0x19   : > { %p3560_p11 = scmp.lt.s32.totalorder %s323_s22, %s323_s22  ;;  %p3561_p12 = scmp.lt.s32.totalorder %s3552_s12, %s3552_s12 }
  0x1a   : > { %p3984_p6 = pnand %p3385_p5, %p4729_p1 }
  0x1b   : > { %p3562_p13 = por %p3561_p12, %p3560_p11 }
  0x1c   : > { %s4747_s27 = scalar_select %p3984_p6, 1, 0 }
  0x1d   : > { %p3994_p7 = pneg %p3984_p6 }
  0x1f   : > { %s4748_s30 = scalar_select %p3994_p7, 1, 0 }
  0x20   : > { %p3555_p9 = pnand %p3553_p8, %p3994_p7 }
  0x22   : > { %p3556_p10 = pneg %p3555_p9 }
  0x24   : > { %p3563_p0 = pnand %p3562_p13, %p3556_p10 }
  0x26   : > { %3566 = shalt.err (!%p3563_p0)
}
  0x27   : > { %s3866_s13 = smov 64   ;;  %s3867_s14 = smov 4  }
  0x28   : > { %s4749_s3 = sld [smem:[#allocation30_spill]]  ;;  %s3578_s21 = scalar_lea.vmem %s3988_s26, 256 }
  0x29   : > { %p3579_p2 = scmp.ne.s32.totalorder %s3988_s26, %s3578_s21  ;;  %p3586_p9 = scmp.lt.s32.totalorder %s3988_s26, %s3988_s26 }
  0x2a   : > { %p3587_p10 = scmp.lt.s32.totalorder %s3578_s21, %s3578_s21 }
  0x2b   : > { %p3581_p5 = pnand %p3579_p2, %p3994_p7 }
  0x2c   : > { %p3588_p11 = por %p3587_p10, %p3586_p9 }
  0x2d   : > { %p3582_p8 = pneg %p3581_p5 }
  0x2e   : > { %3388 = dma.hbm_to_vmem [thread:$0]  (!%p3984_p6), %s4749_s3, 256, %s323_s22, [#allocation9], %s3866_s13, %s3866_s13, %s3867_s14  }
  0x2f   : > { %p3589_p12 = pnand %p3588_p11, %p3582_p8 }
  0x31   : > { %3592 = shalt.err (!%p3589_p12)
}
  0x32   : > { %s4750_s5 = sld [smem:[#allocation31_spill]]  ;;  %s3604_s22 = scalar_lea.vmem %s3990_s29, 256 }
  0x33   : > { %p3605_p13 = scmp.ne.s32.totalorder %s3990_s29, %s3604_s22  ;;  %p3612_p5 = scmp.lt.s32.totalorder %s3990_s29, %s3990_s29 }
  0x34   : > { %p3613_p8 = scmp.lt.s32.totalorder %s3604_s22, %s3604_s22 }
  0x35   : > { %p3607_p0 = pnand %p3605_p13, %p3994_p7 }
  0x36   : > { %p3614_p9 = por %p3613_p8, %p3612_p5 }
  0x37   : > { %p3608_p2 = pneg %p3607_p0 }
  0x38   : > { %3394 = dma.hbm_to_vmem [thread:$0]  (!%p3984_p6), %s4750_s5, 256, %s3988_s26, [#allocation12], %s3866_s13, %s3866_s13, %s3867_s14  }
  0x39   : > { %p3615_p10 = pnand %p3614_p9, %p3608_p2 }
  0x3b   : > { %3618 = shalt.err (!%p3615_p10)
}
  0x3c   : > { %s4751_s7 = sld [smem:[#allocation32_spill]]  ;;  %s3091_s26 = sadd.s32 4294967294, %s3861_s20  }
  0x3d   : > { %s4031_s16 = sadd.s32 1, %s3861_s20   ;;  %s40_s21 = sadd.s32 1, %s3857_s19 }
  0x3e   : > { %4752 = sst [smem:[#allocation26_spill]] %s4031_s16  ;;  %s37_s25 = ssub.s32 %s3861_s20, %s4031_s16 }
  0x3f   : > { %p47_p11 = scmp.ne.s32.totalorder %s3857_s19, %s3853_s18  ;;  %p38_p12 = scmp.eq.s32.totalorder %s37_s25, 0 }
  0x40   : > { %p48_p13 = scmp.eq.s32.totalorder %s3861_s20, 0  ;;  %p53_p0 = scmp.ne.s32.totalorder %s3853_s18, %s3849_s17 }
  0x41   : > { %p297_p2 = scmp.eq.s32.totalorder %s3970_s23, 1  ;;  %p303_p10 = scmp.eq.s32.totalorder %s3091_s26, 1 }
  0x42   : > { %3400 = dma.hbm_to_vmem [thread:$0]  (!%p3984_p6), %s4751_s7, 256, %s3990_s29, [#allocation15], %s3866_s13, %s3866_s13, %s3867_s14  }
  0x43   : > { %s4043_s28 = scalar_select %p38_p12, %s3857_s19, %s40_s21  }
  0x44   : > { %p49_p5 = por %p48_p13, %p47_p11  ;;  %p4047_p8 = por %p4729_p1, %p53_p0 }
  0x45   : > { %4753 = sst [smem:[#allocation27_spill]] %s4043_s28  ;;  %p4051_p9 = por %p297_p2, %p47_p11 }
  0x46   : > { %s4754_s29 = scalar_select %p4047_p8, 1, 0 }
  0x47   : > { %s4755_s13 = scalar_select %p4051_p9, 1, 0 }
  0x48   : > { %p3424_p4 = scmp.lt.s32.totalorder %s3861_s20, 2  ;;  %s4723_s14 = sand.u32 1, %s3857_s19  }
  0x49   : > { %p4057_p3 = por %p303_p10, %p53_p0  ;;  %s4063_s12 = sshll.u32 %s4723_s14, 4 }
  0x4a   : > { %s4066_s15 = sshll.u32 %s3861_s20, 8  ;;  %p4068_p12 = pnand %p3424_p4, %p49_p5 }
  0x4b   : > { %s4756_s22 = scalar_select %p4057_p3, 1, 0 }
  0x4c   : > { %s4758_s21 = scalar_select %p4068_p12, 1, 0 }
  0x4d   : > { %4757 = sst [smem:[#allocation28_spill]] %s4756_s22  ;;  %s422_s25 = sand.u32 1, %s3861_s20  }
  0x4e   : > { %s4759_s1 = sld [smem:[#allocation29_spill]]  ;;  %s426_s14 = scalar_lea.vmem [#allocation5], %s4063_s12 }
  0x4f   : > { %s433_s7 = sshll.u32 %s426_s14, 4  ;;  %s4082_s28 = scalar_lea.sflag [#allocation6], %s422_s25  ;;  %s4080_s7 = int_to_ptr.vmem [resolvable:$true] %s433_s7 }
  0x50   : > { %p4088_p11 = pneg %p4068_p12 }
  0x54   : > { %s4077_s5 = scalar_lea.hbm %s4759_s1, %s4066_s15  ;;  %s3624_s20 = scalar_lea.hbm %s4759_s1, 512 }
  0x55   : > { %s3619_s16 = scalar_lea.hbm %s4077_s5, 256  ;;  %p3625_p2 = scmp.lt.s32.totalorder %s4077_s5, %s4759_s1 }
  0x56   : > { %p3620_p4 = scmp.ne.s32.totalorder %s4077_s5, %s3619_s16  ;;  %p3626_p5 = scmp.lt.s32.totalorder %s3624_s20, %s3619_s16 }
  0x58   : > { %p3622_p13 = pnand %p4088_p11, %p3620_p4  ;;  %p3627_p10 = por %p3626_p5, %p3625_p2 }
  0x5a   : > { %p3623_p0 = pneg %p3622_p13 }
  0x5c   : > { %p3628_p1 = pnand %p3627_p10, %p3623_p0 }
  0x5e   : > { %3631 = shalt.err (!%p3628_p1)
}
  0x5f   : > { %s3632_s25 = scalar_lea.vmem %s4080_s7, 256  ;;  %s3868_s11 = smov [#allocation5]  }
  0x60   : > { %p3633_p3 = scmp.ne.s32.totalorder %s4080_s7, %s3632_s25  ;;  %s3637_s3 = sshll.u32 %s3868_s11, 4  ;;  %s3638_s3 = int_to_ptr.vmem [resolvable:$false] %s3637_s3 }
  0x61   : > { %s3639_s26 = scalar_lea.vmem %s3638_s3, 512  ;;  %p3640_p9 = scmp.lt.s32.totalorder %s4080_s7, %s3638_s3 }
  0x62   : > { %p3635_p4 = pnand %p3633_p3, %p4088_p11  ;;  %p3641_p8 = scmp.lt.s32.totalorder %s3639_s26, %s3632_s25 }
  0x64   : > { %p3636_p13 = pneg %p3635_p4  ;;  %p3642_p6 = por %p3641_p8, %p3640_p9 }
  0x66   : > { %p3643_p7 = pnand %p3642_p6, %p3636_p13 }
  0x68   : > { %3646 = shalt.err (!%p3643_p7)
}
  0x69   : > { %s3869_s17 = smov 128   ;;  %s3870_s20 = smov 8  }
  0x6a   : > { %3410 = dma.hbm_to_vmem [thread:$0]  (!%p4068_p12), %s4077_s5, 256, %s4080_s7, %s4082_s28, %s3869_s17, %s3869_s17, %s3870_s20  }
  0x6b   : > { %s3871_s11 = smov [#allocation10]   ;;  %s3872_s14 = smov [#allocation13]  }
  0x6c   : > { %s336_s16 = sshll.u32 %s3871_s11, 4  ;;  %s360_s25 = sshll.u32 %s3872_s14, 4  ;;  %s337_s16 = int_to_ptr.vmem [resolvable:$true] %s336_s16  ;;  %s361_s25 = int_to_ptr.vmem [resolvable:$true] %s360_s25 }
  0x6d   : > { %s3658_s3 = scalar_lea.vmem %s337_s16, 16  ;;  %p4761_p3 = scmp.ne.s32.totalorder %s4748_s30, 0 }
  0x6e   : > { %p3659_p1 = scmp.ne.s32.totalorder %s337_s16, %s3658_s3  ;;  %s3665_s26 = scalar_lea.vmem %s337_s16, 32 }
  0x6f   : > { %p3666_p8 = scmp.lt.s32.totalorder %s337_s16, %s337_s16  ;;  %p3667_p9 = scmp.lt.s32.totalorder %s3665_s26, %s3658_s3 }
  0x70   : > { %p3661_p6 = pnand %p3659_p1, %p4761_p3 }
  0x71   : > { %p3668_p0 = por %p3667_p9, %p3666_p8 }
  0x72   : > { %p3662_p7 = pneg %p3661_p6 }
  0x74   : > { %p3669_p2 = pnand %p3668_p0, %p3662_p7 }
  0x76   : > { %3672 = shalt.err (!%p3669_p2)
}
  0x77   : > { %p4762_p5 = scmp.ne.s32.totalorder %s4747_s27, 0  ;;  %s3684_s7 = scalar_lea.vmem %s361_s25, 16 }
  0x78   : > { %p3685_p10 = scmp.ne.s32.totalorder %s361_s25, %s3684_s7  ;;  %s3691_s11 = scalar_lea.vmem %s361_s25, 32 }
  0x79   : > { %3391 = dma.hbm_to_vmem [thread:$0]  (!%p4762_p5), %s4714_s4, 16, %s337_s16, [#allocation9]  }
  0x7a   : > { %p3687_p4 = pnand %p3685_p10, %p4761_p3  ;;  %p3692_p1 = scmp.lt.s32.totalorder %s361_s25, %s361_s25 }
  0x7b   : > { %p3693_p6 = scmp.lt.s32.totalorder %s3691_s11, %s3684_s7 }
  0x7c   : > { %p3688_p13 = pneg %p3687_p4 }
  0x7d   : > { %p3694_p12 = por %p3693_p6, %p3692_p1 }
  0x7f   : > { %p3695_p8 = pnand %p3694_p12, %p3688_p13 }
  0x81   : > { %3698 = shalt.err (!%p3695_p8)
}
  0x82   : > { %3397 = dma.hbm_to_vmem [thread:$0]  (!%p4762_p5), %s4716_s6, 16, %s361_s25, [#allocation12]  }
  0x83   : > { %s3873_s1 = smov [#allocation16]  }
  0x84   : > { %s384_s16 = sshll.u32 %s3873_s1, 4  ;;  %s385_s16 = int_to_ptr.vmem [resolvable:$true] %s384_s16 }
  0x85   : > { %s3710_s26 = scalar_lea.vmem %s385_s16, 16  ;;  %s3717_s5 = scalar_lea.vmem %s385_s16, 32 }
  0x86   : > { %p3711_p7 = scmp.ne.s32.totalorder %s385_s16, %s3710_s26  ;;  %p3718_p2 = scmp.lt.s32.totalorder %s385_s16, %s385_s16 }
  0x87   : > { %p3719_p10 = scmp.lt.s32.totalorder %s3717_s5, %s3710_s26 }
  0x88   : > { %p3713_p9 = pnand %p3711_p7, %p4761_p3 }
  0x89   : > { %p3720_p12 = por %p3719_p10, %p3718_p2 }
  0x8a   : > { %p3714_p0 = pneg %p3713_p9 }
  0x8c   : > { %p3721_p4 = pnand %p3720_p12, %p3714_p0 }
  0x8e   : > { %3724 = shalt.err (!%p3721_p4)
}
  0x8f   : > { %3403 = dma.hbm_to_vmem [thread:$0]  (!%p4762_p5), %s4718_s8, 16, %s385_s16, [#allocation15]  }
  0x90   : > { %s4139_s14 = scalar_lea.hbm %s4710_s0, %s4066_s15  ;;  %s405_s3 = scalar_lea.vmem [#allocation2], %s4063_s12 }
  0x91   : > { %s412_s1 = sshll.u32 %s405_s3, 4  ;;  %s4763_s27 = sand.u32 1, %s3857_s19   ;;  %s4142_s1 = int_to_ptr.vmem [resolvable:$true] %s412_s1 }
  0x92   : > { %s402_s26 = scalar_lea.sflag [#allocation3], %s4763_s27  ;;  %s3725_s5 = scalar_lea.hbm %s4139_s14, 256 }
  0x93   : > { %p3726_p3 = scmp.ne.s32.totalorder %s4139_s14, %s3725_s5  ;;  %s3730_s11 = scalar_lea.hbm %s4710_s0, 512 }
  0x94   : > { %p3731_p5 = scmp.lt.s32.totalorder %s4139_s14, %s4710_s0  ;;  %p3732_p6 = scmp.lt.s32.totalorder %s3730_s11, %s3725_s5 }
  0x95   : > { %p3728_p13 = pnand %p3726_p3, %p4088_p11 }
  0x96   : > { %p3733_p8 = por %p3732_p6, %p3731_p5 }
  0x97   : > { %p3729_p1 = pneg %p3728_p13 }
  0x99   : > { %p3734_p7 = pnand %p3733_p8, %p3729_p1 }
  0x9b   : > { %3737 = shalt.err (!%p3734_p7)
}
  0x9c   : > { %s3738_s3 = scalar_lea.vmem %s4142_s1, 256  ;;  %s3874_s27 = smov [#allocation2]  }
  0x9d   : > { %p3739_p9 = scmp.ne.s32.totalorder %s4142_s1, %s3738_s3  ;;  %s3743_s16 = sshll.u32 %s3874_s27, 4  ;;  %s3744_s16 = int_to_ptr.vmem [resolvable:$false] %s3743_s16 }
  0x9e   : > { %s3745_s7 = scalar_lea.vmem %s3744_s16, 512  ;;  %p3746_p10 = scmp.lt.s32.totalorder %s4142_s1, %s3744_s16 }
  0x9f   : > { %p3741_p0 = pnand %p3739_p9, %p4088_p11  ;;  %p3747_p12 = scmp.lt.s32.totalorder %s3745_s7, %s3738_s3 }
  0xa1   : > { %p3742_p2 = pneg %p3741_p0  ;;  %p3748_p4 = por %p3747_p12, %p3746_p10 }
  0xa3   : > { %p3749_p3 = pnand %p3748_p4, %p3742_p2 }
  0xa5   : > { %3752 = shalt.err (!%p3749_p3)
}
  0xa6   : > { %p4764_p13 = scmp.ne.s32.totalorder %s4758_s21, 0  ;;  %s4173_s25 = scalar_lea.hbm %s4712_s2, %s4066_s15 }
  0xa7   : > { %s447_s30 = scalar_lea.vmem [#allocation7], %s4063_s12  ;;  %s3753_s27 = scalar_lea.hbm %s4173_s25, 256 }
  0xa8   : > { %3407 = dma.hbm_to_vmem [thread:$0]  (!%p4764_p13), %s4139_s14, 256, %s4142_s1, %s402_s26, %s3869_s17, %s3869_s17, %s3870_s20  }
  0xa9   : > { %s454_s3 = sshll.u32 %s447_s30, 4  ;;  %p3754_p1 = scmp.ne.s32.totalorder %s4173_s25, %s3753_s27  ;;  %s455_s3 = int_to_ptr.vmem [resolvable:$true] %s454_s3 }
  0xaa   : > { %s3758_s14 = scalar_lea.hbm %s4712_s2, 512  ;;  %p3759_p8 = scmp.lt.s32.totalorder %s4173_s25, %s4712_s2 }
  0xab   : > { %p3756_p5 = pnand %p3754_p1, %p4088_p11  ;;  %p3760_p7 = scmp.lt.s32.totalorder %s3758_s14, %s3753_s27 }
  0xad   : > { %p3757_p6 = pneg %p3756_p5  ;;  %p3761_p9 = por %p3760_p7, %p3759_p8 }
  0xaf   : > { %p3762_p0 = pnand %p3761_p9, %p3757_p6 }
  0xb1   : > { %3765 = shalt.err (!%p3762_p0)
}
  0xb2   : > { %s3766_s12 = scalar_lea.vmem %s455_s3, 256  ;;  %s3875_s15 = smov [#allocation7]  }
  0xb3   : > { %p3767_p2 = scmp.ne.s32.totalorder %s455_s3, %s3766_s12  ;;  %s3771_s5 = sshll.u32 %s3875_s15, 4  ;;  %s3772_s5 = int_to_ptr.vmem [resolvable:$false] %s3771_s5 }
  0xb4   : > { %s3773_s11 = scalar_lea.vmem %s3772_s5, 512  ;;  %p3774_p4 = scmp.lt.s32.totalorder %s455_s3, %s3772_s5 }
  0xb5   : > { %p3769_p10 = pnand %p3767_p2, %p4088_p11  ;;  %p3775_p3 = scmp.lt.s32.totalorder %s3773_s11, %s3766_s12 }
  0xb7   : > { %p3770_p12 = pneg %p3769_p10  ;;  %p3776_p1 = por %p3775_p3, %p3774_p4 }
  0xb9   : > { %p3777_p5 = pnand %p3776_p1, %p3770_p12 }
  0xbb   : > { %3780 = shalt.err (!%p3777_p5)
}
  0xbc   : > { %3413 = dma.hbm_to_vmem [thread:$0]  (!%p4764_p13), %s4173_s25, 256, %s455_s3, %s4082_s28, %s3869_s17, %s3869_s17, %s3870_s20  }
  0xbd   : > { %p4765_p11 = scmp.ne.s32.totalorder %s4746_s24, 0 }
  0xbe   : > { %s4199_s22 = sand.u32 (!%p4765_p11), 1, %s3853_s18   ;;  %p4766_p6 = scmp.ne.s32.totalorder (!%p4765_p11), %s4754_s29, 0 }
  0xbf   : > { %466 = sbr.rel (%p4765_p11) target bundleno = 1712 (0x6b0), region = 64  ;;  %s4202_s30 = sshll.u32 (!%p4765_p11), %s4199_s22, 4 }
  0xc0   : > { %s469_s27 = scalar_lea.sflag (!%p4765_p11), [#allocation3], %s4199_s22  ;;  %s472_s21 = scalar_lea.vmem (!%p4765_p11), [#allocation2], %s4202_s30 }
  0xc4   : > { %3824 = dma.done.wait (%p4766_p6), %s469_s27, 256  }
  0xc5   : > { %3826 = vsyncadd (%p4766_p6), %s469_s27, 4294967040  ;;  %s477_s24 = sand.u32 1, %s3970_s23   ;;  %s481_s17 = scalar_lea.vmem [#allocation5], %s4202_s30 }
  0xc6   : > { %s478_s28 = scalar_lea.sflag [#allocation6], %s477_s24 }
  0xc7   : > { %3828 = dma.done.wait (%p4766_p6), %s478_s28, 512  }
  0xc8   : > { %3830 = vsyncadd (%p4766_p6), %s478_s28, 4294966784  ;;  %s490_s20 = scalar_lea.vmem [#allocation7], %s4202_s30  ;;  %p4767_p13 = scmp.eq.s32.totalorder %s3970_s23, 0 }
  0xca   : > { %3832 = dma.done.wait (%p4767_p13), [#allocation9], 272   ;;  %p4768_p8 = pmov %p4767_p13 }
  0xcc   : > { %3834 = vsyncadd (%p4768_p8), [#allocation9], 4294967024  ;;  %p4769_p7 = pmov %p4768_p8 }
  0xce   : > { %3836 = dma.done.wait (%p4769_p7), [#allocation12], 272   ;;  %p4770_p9 = pmov %p4769_p7 }
  0xcf   : > { %p4771_p0 = pmov %p4769_p7 }
  0xd0   : > { %3838 = vsyncadd (%p4770_p9), [#allocation12], 4294967024 }
  0xd1   : > { %3840 = dma.done.wait (%p4771_p0), [#allocation15], 272   ;;  %p4772_p2 = pmov %p4771_p0 }
  0xd2   : > { %v3876_v0 = vmov 0.0   ;;  %vm3877_vm0 = vmmov 0   ;;  %v3501_v1 = vld [vmem:[#allocation11 + $0x8] sm:$0xff]   ;;  %v3502_v2 = vld [vmem:[#allocation8 + $0x8] sm:$0xff]   ;;  %v3503_v3 = vld [vmem:[#allocation11] sm:$0xff]   ;;  %vm594_vm1 = vcmask 261120   ;;  %v810_v44 = vlaneseq }
  0xd3   : > { %3842 = vsyncadd (%p4772_p2), [#allocation15], 4294967024  ;;  %3233 = vmatprep.subr.bf16.mxu1 %v3876_v0  ;;  %3225 = vmatprep.subr.bf16.mxu0 %v3876_v0  ;;  %v3504_v4 = vld [vmem:[#allocation8] sm:$0xff]   ;;  %v642_v6 = vld [vmem:[%s481_s17 + $0x8] sm:$0xff]  ;;  %s3878_s29 = smov 112   ;;  %s3879_s25 = smov 120  }
  0xd4   : > { %3237 = vmatprep.mubr.msk.bf16.mxu1 %vm3877_vm0, %v3876_v0  ;;  %3229 = vmatprep.mubr.msk.bf16.mxu0 %vm3877_vm0, %v3876_v0  ;;  %v641_v5 = vld [vmem:[%s481_s17] sm:$0xff]  ;;  %v569_v9 = vld [vmem:[%s472_s21 + $0x8] sm:$0xff]  ;;  %s3880_s3 = smov 104   ;;  %v3881_v42 = vmov 1983009808   ;;  %v811_v48 = vshrl.u32 %v810_v44, 7 }
  0xd5   : > { %3234 = vmatpush3.bf16.msra.mxu1 %v3501_v1  ;;  %3226 = vmatpush3.bf16.msra.mxu0 %v3502_v2  ;;  %v568_v7 = vld [vmem:[%s472_s21] sm:$0xff]  ;;  %v643_v8 = vpack.c.bf16 %v642_v6, %v641_v5  ;;  %v714_v14 = vld [vmem:[%s490_s20 + $0x8] sm:$0xff]  ;;  %v808_v43 = vunpack.c.l.s4 %v3881_v42  ;;  %v3882_v45 = vmov 1934713408   ;;  %vm1685_vm2 = vcmask 64512   ;;  %s3883_s26 = smov 16  }
  0xd6   : > { %3235 = vmatprep.subr.bf16.mxu1 %v3876_v0  ;;  %3227 = vmatprep.subr.bf16.mxu0 %v3876_v0  ;;  %v570_v10 = vpack.c.bf16 %v569_v9, %v568_v7  ;;  %v3505_v11 = vld [vmem:[#allocation14 + $0x8] sm:$0xff]   ;;  %v3506_v12 = vld [vmem:[#allocation14] sm:$0xff]   ;;  %v3124_v16 = vld [vmem:[#allocation13] ss:$0 sm:$0xff]  ;;  %v840_v46 = vunpack.c.l.s4 %v3882_v45  ;;  %vm2153_vm3 = vcmask 1043456   ;;  %s3884_s12 = smov 8  }
  0xd7   : > { %v713_v13 = vld [vmem:[%s490_s20] sm:$0xff]  ;;  %v809_v47 = vunpack.c.0.s8 %v808_v43  ;;  %s3885_s15 = smov 24   ;;  %vm2817_vm4 = vcmask 130048   ;;  %vm2820_vm5 = vcmask 195584   ;;  %s3119_s30 = sshll.u32 %s4199_s22, 3  ;;  %vm2901_vm6 = vcmask 257024  }
  0xd8   : > { %v715_v15 = vpack.c.bf16 %v714_v14, %v713_v13  ;;  %v3120_v20 = vld [vmem:[#allocation10] ss:$0 sm:$0xff]  ;;  %v3128_v34 = vld [vmem:[#allocation16] ss:$0 sm:$0xff]  ;;  %v841_v51 = vunpack.c.0.s8 %v840_v46  ;;  %s3180_s27 = sshll.u32 %s3970_s23, 7  ;;  %s562_s21 = scalar_lea.vmem [#allocation17], %s3119_s30 }
  0xd9   : > { %3236 = vmatpush3.bf16.msra.mxu1 %v3503_v3  ;;  %3228 = vmatpush3.bf16.msra.mxu0 %v3504_v4  ;;  %v4291_v52 = vsub.s32 %v809_v47, %v811_v48  ;;  %s2918_s24 = sshll.u32 %s562_s21, 4  ;;  %s4773_s20 = sld [smem:[#allocation33_spill]]  ;;  %s4667_s24 = int_to_ptr.vmem [resolvable:$true] %s2918_s24 }
  0xda   : > { %3249 = vmatprep.subr.bf16.mxu1 %v3876_v0  ;;  %3241 = vmatprep.subr.bf16.mxu0 %v3876_v0  ;;  %v4293_v59 = vsub.s32 %v841_v51, %v811_v48  ;;  %s3781_s16 = scalar_lea.vmem %s4667_s24, 128  ;;  %p4775_p12 = scmp.ne.s32.totalorder %s4755_s13, 0 }
  0xdb   : > { %p3782_p10 = scmp.ne.s32.totalorder %s4667_s24, %s3781_s16  ;;  %s3886_s23 = smov [#allocation17]  }
  0xdc   : > { %3238 = vmatmul.mubr.msk.bf16.vlgmr.msra.gmra.mxu1 %vm594_vm1, %v643_v8  ;;  %3230 = vmatmul.mubr.msk.bf16.vlgmr.msra.gmra.mxu0 %vm594_vm1, %v570_v10  ;;  %s3785_s7 = sshll.u32 %s3886_s23, 4  ;;  %s3786_s7 = int_to_ptr.vmem [resolvable:$false] %s3785_s7 }
  0xdd   : > { %3251 = vmatprep.mubr.msk.bf16.mxu1 %vm3877_vm0, %v3876_v0  ;;  %3245 = vmatprep.mubr.msk.bf16.mxu0 %vm3877_vm0, %v3876_v0  ;;  %p3783_p4 = pnand %p3782_p10, %p4775_p12  ;;  %s3787_s14 = scalar_lea.vmem %s3786_s7, 256 }
  0xde   : > { %3242 = vmatpush3.bf16.msra.mxu0 %v3505_v11  ;;  %p3788_p1 = scmp.lt.s32.totalorder %s4667_s24, %s3786_s7  ;;  %p3789_p5 = scmp.lt.s32.totalorder %s3787_s14, %s3781_s16 }
  0xdf   : > { %3243 = vmatprep.subr.bf16.mxu0 %v3876_v0  ;;  %p3784_p3 = pneg %p3783_p4 }
  0xe0   : > { %p3790_p11 = por %p3789_p5, %p3788_p1 }
  0xe2   : > { %3244 = vmatpush3.bf16.msra.mxu0 %v3506_v12  ;;  %p3791_p6 = pnand %p3790_p11, %p3784_p3 }
  0xe3   : > { %3255 = vmatprep.subr.bf16.mxu0 %v3876_v0 }
  0xe5   : > { %3246 = vmatmul.mubr.msk.bf16.vlgmr.msra.gmra.mxu0 %vm594_vm1, %v715_v15 }
  0xe6   : > { %3257 = vmatprep.mubr.msk.bf16.mxu0 %vm3877_vm0, %v3876_v0 }
 0x19c   : > { %v704_v17 = vpop.f32.mrf.mxu1  ;;  %v632_v19 = vpop.f32.mrf.mxu0 }
 0x19d   : > { %v705_v18 = vadd.f32 %v3124_v16, %v704_v17  ;;  %v633_v25 = vadd.f32 %v3120_v20, %v632_v19 }
 0x19e   : > { %v3239_v21 = vpop.f32.mrf.mxu1  ;;  %v3231_v23 = vpop.f32.mrf.mxu0 }
 0x19f   : > { %v711_v22 = vmax.f32 %v705_v18, 0.0  ;;  %v4262_v31 = vmax.f32 %v633_v25, 0.0 }
 0x1a0   : > { %v707_v24 = vpop.f32.mrf.mxu1  ;;  %v635_v27 = vpop.f32.mrf.mxu0 }
 0x1a1   : > { %v708_v26 = vadd.f32 %v3124_v16, %v707_v24  ;;  %1093 = vrot.lane.b32.xlu1 %v711_v22, %s3878_s29  ;;  %1087 = vrot.lane.b32.xlu0 %v711_v22, %s3879_s25  ;;  %v636_v32 = vadd.f32 %v3120_v20, %v635_v27 }
 0x1a2   : > { %v3240_v28 = vpop.f32.mrf.mxu1  ;;  %v3232_v30 = vpop.f32.mrf.mxu0 }
 0x1a3   : > { %v4260_v29 = vmax.f32 %v708_v26, 0.0  ;;  %v4271_v33 = vmax.f32 %v636_v32, 0.0 }
 0x1a5   : > { %1099 = vrot.lane.b32.xlu0 %v711_v22, %s3880_s3  ;;  %1095 = vrot.lane.b32.xlu1 %v4260_v29, %s3878_s29  ;;  %v776_v35 = vpop.f32.mrf.mxu0 }
 0x1a6   : > { %v777_v36 = vadd.f32 %v3128_v34, %v776_v35 }
 0x1a7   : > { %v3247_v37 = vpop.f32.mrf.mxu0 }
 0x1a8   : > { %v4285_v38 = vmax.f32 %v777_v36, 0.0 }
 0x1a9   : > { %1101 = vrot.lane.b32.xlu1 %v4260_v29, %s3880_s3  ;;  %787 = vrot.lane.b32.xlu0 %v4262_v31, %s3879_s25  ;;  %v779_v39 = vpop.f32.mrf.mxu0 }
 0x1aa   : > { %v4287_v40 = vadd.f32 %v3128_v34, %v779_v39 }
 0x1ab   : > { %v3248_v41 = vpop.f32.mrf.mxu0 }
 0x1ad   : > { %1089 = vrot.lane.b32.xlu0 %v4260_v29, %s3879_s25  ;;  %789 = vrot.lane.b32.xlu1 %v4271_v33, %s3879_s25 }
 0x1b1   : > { %793 = vrot.lane.b32.xlu0 %v4262_v31, %s3878_s29  ;;  %795 = vrot.lane.b32.xlu1 %v4271_v33, %s3878_s29 }
 0x1b5   : > { %799 = vrot.lane.b32.xlu0 %v4262_v31, %s3880_s3  ;;  %801 = vrot.lane.b32.xlu1 %v4271_v33, %s3880_s3 }
 0x1b9   : > { %1387 = vrot.lane.b32.xlu1 %v4285_v38, %s3879_s25 }
 0x213   : > { %v1094_v49 = vpop.permute.xlu1 %1093  ;;  %v1088_v50 = vpop.permute.xlu0 %1087 }
 0x214   : > { %v1105_v53 = vcombine.low %v711_v22, %v1094_v49  ;;  %v1106_v54 = vcombine.high %v711_v22, %v1094_v49 }
 0x216   : > { %v1113_v60 = vrot.slane %v1105_v53, %v4291_v52  ;;  %v1120_v61 = vrot.slane %v1106_v54, %v4291_v52 }
 0x217   : > { %v1100_v55 = vpop.permute.xlu0 %1099  ;;  %v1096_v56 = vpop.permute.xlu1 %1095 }
 0x218   : > { %v1121_v57 = vcombine.low %v1088_v50, %v1100_v55  ;;  %v1122_v58 = vcombine.high %v1088_v50, %v1100_v55  ;;  %v1173_v7 = vcombine.low %v4260_v29, %v1096_v56  ;;  %v1174_v8 = vcombine.high %v4260_v29, %v1096_v56 }
 0x21a   : > { %v1129_v62 = vrot.slane %v1121_v57, %v4291_v52  ;;  %v1136_v63 = vrot.slane %v1122_v58, %v4291_v52  ;;  %v1181_v23 = vrot.slane %v1173_v7, %v4291_v52  ;;  %v1188_v24 = vrot.slane %v1174_v8, %v4291_v52 }
 0x21b   : > { %v1102_v1 = vpop.permute.xlu1 %1101  ;;  %v788_v2 = vpop.permute.xlu0 %787 }
 0x21c   : > { %v1137_v3 = vcombine.low %v1113_v60, %v1129_v62  ;;  %v1138_v4 = vcombine.high %v1113_v60, %v1129_v62  ;;  %v1153_v5 = vcombine.low %v1120_v61, %v1136_v63  ;;  %v1154_v6 = vcombine.high %v1120_v61, %v1136_v63 }
 0x21e   : > { %v1145_v9 = vrot.slane %v1137_v3, %v4293_v59  ;;  %v1152_v10 = vrot.slane %v1138_v4, %v4293_v59  ;;  %v1161_v11 = vrot.slane %v1153_v5, %v4293_v59  ;;  %v1168_v12 = vrot.slane %v1154_v6, %v4293_v59 }
 0x21f   : > { %v1090_v13 = vpop.permute.xlu0 %1089  ;;  %v790_v14 = vpop.permute.xlu1 %789 }
 0x220   : > { %v1241_v15 = vcombine.low %v1145_v9, %v1152_v10  ;;  %v3136_v16 = vcombine.high %v1145_v9, %v1152_v10  ;;  %v1257_v17 = vcombine.low %v1161_v11, %v1168_v12  ;;  %v3137_v18 = vcombine.high %v1161_v11, %v1168_v12 }
 0x221   : > { %v1189_v19 = vcombine.low %v1090_v13, %v1102_v1  ;;  %v1190_v20 = vcombine.high %v1090_v13, %v1102_v1 }
 0x222   : > { %v4306_v21 = vrot.slane %v1241_v15, %v4291_v52  ;;  %v4309_v22 = vrot.slane %v3136_v16, %v4291_v52  ;;  %v4314_v25 = vrot.slane %v1257_v17, %v4291_v52  ;;  %v4317_v26 = vrot.slane %v3137_v18, %v4291_v52 }
 0x223   : > { %v1197_v27 = vrot.slane %v1189_v19, %v4291_v52  ;;  %v1204_v28 = vrot.slane %v1190_v20, %v4291_v52  ;;  %v794_v29 = vpop.permute.xlu0 %793  ;;  %v796_v30 = vpop.permute.xlu1 %795 }
 0x224   : > { %v805_v32 = vcombine.low %v4262_v31, %v794_v29  ;;  %v806_v34 = vcombine.high %v4262_v31, %v794_v29  ;;  %v873_v35 = vcombine.low %v4271_v33, %v796_v30  ;;  %v874_v36 = vcombine.high %v4271_v33, %v796_v30 }
 0x225   : > { %v1205_v37 = vcombine.low %v1181_v23, %v1197_v27  ;;  %v1206_v39 = vcombine.high %v1181_v23, %v1197_v27  ;;  %v1221_v41 = vcombine.low %v1188_v24, %v1204_v28  ;;  %v1222_v42 = vcombine.high %v1188_v24, %v1204_v28 }
 0x226   : > { %v813_v43 = vrot.slane %v805_v32, %v4291_v52  ;;  %v820_v44 = vrot.slane %v806_v34, %v4291_v52  ;;  %v881_v45 = vrot.slane %v873_v35, %v4291_v52  ;;  %v888_v46 = vrot.slane %v874_v36, %v4291_v52 }
 0x227   : > { %v1213_v47 = vrot.slane %v1205_v37, %v4293_v59  ;;  %v1220_v31 = vrot.slane %v1206_v39, %v4293_v59  ;;  %v1229_v48 = vrot.slane %v1221_v41, %v4293_v59  ;;  %v1236_v33 = vrot.slane %v1222_v42, %v4293_v59  ;;  %v800_v49 = vpop.permute.xlu0 %799  ;;  %v802_v50 = vpop.permute.xlu1 %801 }
 0x228   : > { %v821_v51 = vcombine.low %v788_v2, %v800_v49  ;;  %v822_v53 = vcombine.high %v788_v2, %v800_v49  ;;  %v889_v54 = vcombine.low %v790_v14, %v802_v50  ;;  %v890_v55 = vcombine.high %v790_v14, %v802_v50 }
 0x229   : > { %v1309_v56 = vcombine.low %v1213_v47, %v1220_v31  ;;  %v3138_v57 = vcombine.high %v1213_v47, %v1220_v31  ;;  %v1325_v58 = vcombine.low %v1229_v48, %v1236_v33  ;;  %v3139_v60 = vcombine.high %v1229_v48, %v1236_v33 }
 0x22a   : > { %v829_v61 = vrot.slane %v821_v51, %v4291_v52  ;;  %v836_v62 = vrot.slane %v822_v53, %v4291_v52  ;;  %v897_v63 = vrot.slane %v889_v54, %v4291_v52  ;;  %v904_v1 = vrot.slane %v890_v55, %v4291_v52 }
 0x22b   : > { %v4338_v3 = vrot.slane %v1309_v56, %v4291_v52  ;;  %v4341_v4 = vrot.slane %v3138_v57, %v4291_v52  ;;  %v4344_v2 = vrot.slane %v1325_v58, %v4291_v52  ;;  %v4347_v5 = vrot.slane %v3139_v60, %v4291_v52 }
 0x22c   : > { %v837_v6 = vcombine.low %v813_v43, %v829_v61  ;;  %v838_v7 = vcombine.high %v813_v43, %v829_v61  ;;  %v853_v8 = vcombine.low %v820_v44, %v836_v62  ;;  %v854_v9 = vcombine.high %v820_v44, %v836_v62 }
 0x22d   : > { %v905_v10 = vcombine.low %v881_v45, %v897_v63  ;;  %v906_v11 = vcombine.high %v881_v45, %v897_v63  ;;  %v921_v12 = vcombine.low %v888_v46, %v904_v1  ;;  %v922_v13 = vcombine.high %v888_v46, %v904_v1 }
 0x22e   : > { %v845_v14 = vrot.slane %v837_v6, %v4293_v59  ;;  %v852_v15 = vrot.slane %v838_v7, %v4293_v59  ;;  %v861_v16 = vrot.slane %v853_v8, %v4293_v59  ;;  %v868_v17 = vrot.slane %v854_v9, %v4293_v59 }
 0x22f   : > { %v913_v18 = vrot.slane %v905_v10, %v4293_v59  ;;  %v920_v19 = vrot.slane %v906_v11, %v4293_v59  ;;  %v929_v20 = vrot.slane %v921_v12, %v4293_v59  ;;  %v936_v23 = vrot.slane %v922_v13, %v4293_v59 }
 0x230   : > { %v941_v24 = vcombine.low %v845_v14, %v852_v15  ;;  %v3132_v27 = vcombine.high %v845_v14, %v852_v15  ;;  %v957_v28 = vcombine.low %v861_v16, %v868_v17  ;;  %v3133_v29 = vcombine.high %v861_v16, %v868_v17 }
 0x231   : > { %v1009_v30 = vcombine.low %v913_v18, %v920_v19  ;;  %v3134_v32 = vcombine.high %v913_v18, %v920_v19  ;;  %v1025_v34 = vcombine.low %v929_v20, %v936_v23  ;;  %v3135_v35 = vcombine.high %v929_v20, %v936_v23 }
 0x232   : > { %v4358_v36 = vrot.slane %v941_v24, %v4291_v52  ;;  %v4361_v37 = vrot.slane %v3132_v27, %v4291_v52  ;;  %v4364_v39 = vrot.slane %v957_v28, %v4291_v52  ;;  %v4367_v41 = vrot.slane %v3133_v29, %v4291_v52 }
 0x233   : > { %v4370_v42 = vrot.slane %v1009_v30, %v4291_v52  ;;  %v4373_v43 = vrot.slane %v3134_v32, %v4291_v52  ;;  %v4376_v44 = vrot.slane %v1025_v34, %v4291_v52  ;;  %v4379_v45 = vrot.slane %v3135_v35, %v4291_v52 }
 0x234   : > { %v973_v46 = vcombine.low %v4358_v36, %v4361_v37  ;;  %v989_v47 = vcombine.low %v4364_v39, %v4367_v41  ;;  %v1273_v33 = vcombine.low %v4306_v21, %v4309_v22  ;;  %v1289_v49 = vcombine.low %v4314_v25, %v4317_v26 }
 0x235   : > { %v1041_v31 = vcombine.low %v4370_v42, %v4373_v43  ;;  %v1057_v48 = vcombine.low %v4376_v44, %v4379_v45  ;;  %v1341_v50 = vcombine.low %v4338_v3, %v4341_v4  ;;  %v1357_v51 = vcombine.low %v4344_v2, %v4347_v5 }
 0x236   : > { %v981_v53 = vrot.slane %v973_v46, %v4293_v59  ;;  %v997_v54 = vrot.slane %v989_v47, %v4293_v59  ;;  %v1281_v57 = vrot.slane %v1273_v33, %v4293_v59  ;;  %v1297_v58 = vrot.slane %v1289_v49, %v4293_v59 }
 0x237   : > { %v1049_v55 = vrot.slane %v1041_v31, %v4293_v59  ;;  %v1065_v56 = vrot.slane %v1057_v48, %v4293_v59  ;;  %v1349_v60 = vrot.slane %v1341_v50, %v4293_v59  ;;  %v1365_v61 = vrot.slane %v1357_v51, %v4293_v59 }
 0x238   : > { %v1305_v62 = vcombine.low %v1281_v57, %v1297_v58  ;;  %v1005_v7 = vcombine.low %v981_v53, %v997_v54  ;;  %v1306_v9 = vcombine.high %v1281_v57, %v1297_v58  ;;  %v1274_v11 = vcombine.high %v4306_v21, %v4309_v22 }
 0x239   : > { %v1373_v63 = vcombine.low %v1349_v60, %v1365_v61  ;;  %v1073_v8 = vcombine.low %v1049_v55, %v1065_v56  ;;  %v1374_v10 = vcombine.high %v1349_v60, %v1365_v61  ;;  %v1290_v12 = vcombine.high %v4314_v25, %v4317_v26 }
 0x23a   : > { %v1377_v1 = vpack.c.bf16 %v1305_v62, %v1305_v62  ;;  %v1342_v15 = vcombine.high %v4338_v3, %v4341_v4  ;;  %v1358_v16 = vcombine.high %v4344_v2, %v4347_v5  ;;  %v1077_v21 = vpack.c.bf16 %v1005_v7, %v1005_v7 }
 0x23b   : > { %v1378_v6 = vpack.c.bf16 %v1373_v63, %v1373_v63  ;;  %v1078_v22 = vpack.c.bf16 %v1073_v8, %v1073_v8  ;;  %v1379_v17 = vpack.c.bf16 %v1306_v9, %v1306_v9  ;;  %v1380_v25 = vpack.c.bf16 %v1374_v10, %v1374_v10 }
 0x23c   : > { %v1690_v13 = vsel %vm1685_vm2, %v1377_v1, 0  ;;  %v1288_v26 = vrot.slane %v1274_v11, %v4293_v59  ;;  %v1304_v18 = vrot.slane %v1290_v12, %v4293_v59  ;;  %v1356_v19 = vrot.slane %v1342_v15, %v4293_v59 }
 0x23d   : > { %v1736_v14 = vsel %vm1685_vm2, %v1378_v6, 0  ;;  %3250 = vmatpush3.bf16.xpose.msra.mxu1 %v1690_v13  ;;  %v1372_v3 = vrot.slane %v1358_v16, %v4293_v59  ;;  %v1782_v4 = vsel %vm1685_vm2, %v1379_v17, 0  ;;  %v1828_v2 = vsel %vm1685_vm2, %v1380_v25, 0 }
 0x23e   : > { %3256 = vmatpush3.bf16.xpose.msra.mxu0 %v1736_v14  ;;  %3261 = vmatprep.subr.bf16.mxu1 %v3876_v0  ;;  %v1307_v5 = vcombine.low %v1288_v26, %v1304_v18  ;;  %v974_v23 = vcombine.high %v4358_v36, %v4361_v37  ;;  %v1006_v24 = vcombine.high %v981_v53, %v997_v54 }
 0x23f   : > { %3267 = vmatprep.subr.bf16.mxu0 %v3876_v0  ;;  %v1375_v20 = vcombine.low %v1356_v19, %v1372_v3  ;;  %v1074_v27 = vcombine.high %v1049_v55, %v1065_v56  ;;  %v990_v28 = vcombine.high %v4364_v39, %v4367_v41  ;;  %v1042_v29 = vcombine.high %v4370_v42, %v4373_v43 }
 0x240   : > { %v1058_v30 = vcombine.high %v4376_v44, %v4379_v45  ;;  %v1381_v32 = vpack.c.bf16 %v1307_v5, %v1307_v5  ;;  %v1079_v35 = vpack.c.bf16 %v1006_v24, %v1006_v24  ;;  %v988_v37 = vrot.slane %v974_v23, %v4293_v59 }
 0x241   : > { %v1382_v34 = vpack.c.bf16 %v1375_v20, %v1375_v20  ;;  %v1080_v36 = vpack.c.bf16 %v1074_v27, %v1074_v27  ;;  %v1004_v39 = vrot.slane %v990_v28, %v4293_v59  ;;  %v1056_v41 = vrot.slane %v1042_v29, %v4293_v59 }
 0x242   : > { %v1072_v42 = vrot.slane %v1058_v30, %v4293_v59  ;;  %v1874_v43 = vsel %vm1685_vm2, %v1381_v32, 0  ;;  %v1308_v45 = vcombine.high %v1288_v26, %v1304_v18  ;;  %v1376_v46 = vcombine.high %v1356_v19, %v1372_v3 }
 0x243   : > { %v1920_v44 = vsel %vm1685_vm2, %v1382_v34, 0  ;;  %v1007_v47 = vcombine.low %v988_v37, %v1004_v39  ;;  %v1008_v54 = vcombine.high %v988_v37, %v1004_v39  ;;  %v4486_v39 = vmax.f32 %v4287_v40, 0.0 }
 0x244   : > { %3252 = vmatmul.mubr.msk.bf16.vlgmr.msra.gmra.mxu1 %vm1685_vm2, %v1077_v21  ;;  %v1075_v31 = vcombine.low %v1056_v41, %v1072_v42  ;;  %v1383_v48 = vpack.c.bf16 %v1308_v45, %v1308_v45  ;;  %v1384_v33 = vpack.c.bf16 %v1376_v46, %v1376_v46  ;;  %v1076_v55 = vcombine.high %v1056_v41, %v1072_v42  ;;  %v4492_v41 = vpop.permute.xlu1 %1387 }
 0x245   : > { %3258 = vmatmul.mubr.msk.bf16.vlgmr.msra.gmra.mxu0 %vm1685_vm2, %v1078_v22  ;;  %3262 = vmatpush3.bf16.xpose.msra.mxu1 %v1782_v4  ;;  %v1081_v49 = vpack.c.bf16 %v1007_v47, %v1007_v47  ;;  %v1083_v56 = vpack.c.bf16 %v1008_v54, %v1008_v54 }
 0x246   : > { %3268 = vmatpush3.bf16.xpose.msra.mxu0 %v1828_v2  ;;  %3263 = vmatprep.mubr.msk.bf16.mxu1 %vm3877_vm0, %v3876_v0  ;;  %v1082_v50 = vpack.c.bf16 %v1075_v31, %v1075_v31  ;;  %v1966_v51 = vsel %vm1685_vm2, %v1383_v48, 0  ;;  %v2012_v53 = vsel %vm1685_vm2, %v1384_v33, 0  ;;  %v1084_v57 = vpack.c.bf16 %v1076_v55, %v1076_v55 }
 0x247   : > { %3269 = vmatprep.mubr.msk.bf16.mxu0 %vm3877_vm0, %v3876_v0  ;;  %3273 = vmatprep.subr.bf16.mxu1 %v3876_v0 }
 0x248   : > { %3279 = vmatprep.subr.bf16.mxu0 %v3876_v0 }
 0x24c   : > { %3264 = vmatmul.mubr.msk.bf16.vlgmr.msra.gmra.mxu1 %vm1685_vm2, %v1079_v35 }
 0x24d   : > { %3270 = vmatmul.mubr.msk.bf16.vlgmr.msra.gmra.mxu0 %vm1685_vm2, %v1080_v36  ;;  %3274 = vmatpush3.bf16.xpose.msra.mxu1 %v1874_v43 }
 0x24e   : > { %3280 = vmatpush3.bf16.xpose.msra.mxu0 %v1920_v44  ;;  %3275 = vmatprep.mubr.msk.bf16.mxu1 %vm3877_vm0, %v3876_v0 }
 0x24f   : > { %3281 = vmatprep.mubr.msk.bf16.mxu0 %vm3877_vm0, %v3876_v0  ;;  %3285 = vmatprep.subr.bf16.mxu1 %v3876_v0 }
 0x250   : > { %3291 = vmatprep.subr.bf16.mxu0 %v3876_v0 }
 0x254   : > { %3276 = vmatmul.mubr.msk.bf16.vlgmr.msra.gmra.mxu1 %vm1685_vm2, %v1081_v49 }
 0x255   : > { %3282 = vmatmul.mubr.msk.bf16.vlgmr.msra.gmra.mxu0 %vm1685_vm2, %v1082_v50  ;;  %3286 = vmatpush3.bf16.xpose.msra.mxu1 %v1966_v51 }
 0x256   : > { %3292 = vmatpush3.bf16.xpose.msra.mxu0 %v2012_v53  ;;  %3287 = vmatprep.mubr.msk.bf16.mxu1 %vm3877_vm0, %v3876_v0 }
 0x257   : > { %3293 = vmatprep.mubr.msk.bf16.mxu0 %vm3877_vm0, %v3876_v0  ;;  %3297 = vmatprep.subr.bf16.mxu1 %v3876_v0 }
 0x258   : > { %3303 = vmatprep.subr.bf16.mxu0 %v3876_v0 }
 0x25c   : > { %3288 = vmatmul.mubr.msk.bf16.vlgmr.msra.gmra.mxu1 %vm1685_vm2, %v1083_v56 }
 0x25d   : > { %3294 = vmatmul.mubr.msk.bf16.vlgmr.msra.gmra.mxu0 %vm1685_vm2, %v1084_v57  ;;  %3299 = vmatprep.mubr.msk.bf16.mxu1 %vm3877_vm0, %v3876_v0 }
 0x25e   : > { %3305 = vmatprep.mubr.msk.bf16.mxu0 %vm3877_vm0, %v3876_v0 }
 0x304   : > { %v1726_v58 = vpop.f32.mrf.mxu1 }
 0x305   : > { %v1772_v60 = vpop.f32.mrf.mxu0  ;;  %v2054_v61 = vsel %vm1685_vm2, %v1726_v58, -inf }
 0x306   : > { %v2057_v62 = vsel %vm1685_vm2, %v1772_v60, -inf  ;;  %2055 = vmax.xlane.f32.xlu0 %v2054_v61  ;;  %v3253_v63 = vpop.f32.mrf.mxu1 }
 0x307   : > { %2058 = vmax.xlane.f32.xlu1 %v2057_v62  ;;  %v3259_v1 = vpop.f32.mrf.mxu0 }
 0x308   : > { %v1729_v6 = vpop.f32.mrf.mxu1 }
 0x309   : > { %v1775_v7 = vpop.f32.mrf.mxu0 }
 0x30a   : > { %v3254_v8 = vpop.f32.mrf.mxu1 }
 0x30b   : > { %v3260_v9 = vpop.f32.mrf.mxu0 }
 0x30c   : > { %v4471_v10 = vpop.f32.mrf.mxu1 }
 0x30d   : > { %v1864_v11 = vpop.f32.mrf.mxu0  ;;  %v2060_v12 = vsel %vm1685_vm2, %v4471_v10, -inf }
 0x30e   : > { %2061 = vmax.xlane.f32.xlu0 %v2060_v12  ;;  %v3265_v13 = vpop.f32.mrf.mxu1  ;;  %v2063_v21 = vsel %vm1685_vm2, %v1864_v11, -inf }
 0x30f   : > { %v3271_v14 = vpop.f32.mrf.mxu0 }
 0x310   : > { %v1821_v15 = vpop.f32.mrf.mxu1 }
 0x311   : > { %v1867_v16 = vpop.f32.mrf.mxu0 }
 0x312   : > { %v3266_v22 = vpop.f32.mrf.mxu1  ;;  %2064 = vmax.xlane.f32.xlu0 %v2063_v21 }
 0x313   : > { %v3272_v17 = vpop.f32.mrf.mxu0 }
 0x314   : > { %v1910_v25 = vpop.f32.mrf.mxu1 }
 0x315   : > { %v4476_v26 = vpop.f32.mrf.mxu0  ;;  %v2066_v18 = vsel %vm1685_vm2, %v1910_v25, -inf }
 0x316   : > { %v2069_v19 = vsel %vm1685_vm2, %v4476_v26, -inf  ;;  %v3277_v3 = vpop.f32.mrf.mxu1  ;;  %2067 = vmax.xlane.f32.xlu1 %v2066_v18 }
 0x317   : > { %2070 = vmax.xlane.f32.xlu0 %v2069_v19  ;;  %v3283_v4 = vpop.f32.mrf.mxu0 }
 0x318   : > { %v1913_v2 = vpop.f32.mrf.mxu1 }
 0x319   : > { %v1959_v5 = vpop.f32.mrf.mxu0 }
 0x31a   : > { %v3278_v20 = vpop.f32.mrf.mxu1 }
 0x31b   : > { %v3284_v23 = vpop.f32.mrf.mxu0 }
 0x31c   : > { %v2002_v24 = vpop.f32.mrf.mxu1 }
 0x31d   : > { %v2048_v27 = vpop.f32.mrf.mxu0  ;;  %v2072_v28 = vsel %vm1685_vm2, %v2002_v24, -inf }
 0x31e   : > { %v2075_v29 = vsel %vm1685_vm2, %v2048_v27, -inf  ;;  %v3289_v30 = vpop.f32.mrf.mxu1  ;;  %2073 = vmax.xlane.f32.xlu1 %v2072_v28 }
 0x31f   : > { %2076 = vmax.xlane.f32.xlu0 %v2075_v29  ;;  %v3295_v32 = vpop.f32.mrf.mxu0 }
 0x320   : > { %v2005_v34 = vpop.f32.mrf.mxu1 }
 0x321   : > { %v2051_v35 = vpop.f32.mrf.mxu0 }
 0x322   : > { %v3290_v36 = vpop.f32.mrf.mxu1 }
 0x323   : > { %v3296_v37 = vpop.f32.mrf.mxu0 }
 0x32f   : > { %1393 = vrot.lane.b32.xlu1 %v4285_v38, %s3878_s29 }
 0x333   : > { %1395 = vrot.lane.b32.xlu1 %v4486_v39, %s3878_s29  ;;  %s4774_s29 = smov %s4773_s20 }
 0x335   : > { %1389 = vrot.lane.b32.xlu0 %v4486_v39, %s3879_s25  ;;  %s4665_s25 = scalar_lea.hbm %s4773_s20, %s3180_s27 }
 0x38f   : > { %v2056_v42 = vpop.xlane.xlu0 %2055 }
 0x390   : > { %v2059_v43 = vpop.xlane.xlu1 %2058  ;;  %v2078_v44 = vsub.f32 %v1726_v58, %v2056_v42 }
 0x391   : > { %v2079_v45 = vsub.f32 %v1772_v60, %v2059_v43 }
 0x392   : > { %v2086_v46 = vmul.f32 1.442695, %v2078_v44 }
 0x393   : > { %v2088_v47 = vmul.f32 1.442695, %v2079_v45 }
 0x394   : > { %3509 = vpow2.f32 %v2086_v46 }
 0x395   : > { %3511 = vpow2.f32 %v2088_v47 }
 0x397   : > { %v2062_v49 = vpop.xlane.xlu0 %2061 }
 0x398   : > { %v2080_v54 = vsub.f32 %v4471_v10, %v2062_v49 }
 0x39a   : > { %v2090_v58 = vmul.f32 1.442695, %v2080_v54 }
 0x39b   : > { %v2065_v50 = vpop.xlane.xlu0 %2064 }
 0x39c   : > { %v2081_v53 = vsub.f32 %v1864_v11, %v2065_v50 }
 0x39e   : > { %v2092_v56 = vmul.f32 1.442695, %v2081_v53 }
 0x39f   : > { %v2068_v51 = vpop.xlane.xlu1 %2067 }
 0x3a0   : > { %v2082_v60 = vsub.f32 %v1910_v25, %v2068_v51  ;;  %v2071_v61 = vpop.xlane.xlu0 %2070  ;;  %3513 = vpow2.f32 %v2092_v56 }
 0x3a1   : > { %v4494_v31 = vpop.eup %3509  ;;  %3515 = vpow2.f32 %v2090_v58  ;;  %v2083_v1 = vsub.f32 %v4476_v26, %v2071_v61 }
 0x3a2   : > { %v4496_v40 = vpop.eup %3511  ;;  %v2102_v48 = vsel %vm1685_vm2, %v4494_v31, 0.0  ;;  %v2094_v63 = vmul.f32 1.442695, %v2082_v60 }
 0x3a3   : > { %2103 = vadd.xlane.f32.xlu1 %v2102_v48  ;;  %v2105_v33 = vsel %vm1685_vm2, %v4496_v40, 0.0  ;;  %v2096_v7 = vmul.f32 1.442695, %v2083_v1 }
 0x3a4   : > { %2106 = vadd.xlane.f32.xlu0 %v2105_v33 }
 0x3a7   : > { %v2074_v55 = vpop.xlane.xlu1 %2073 }
 0x3a8   : > { %v2084_v57 = vsub.f32 %v2002_v24, %v2074_v55  ;;  %v2077_v6 = vpop.xlane.xlu0 %2076 }
 0x3a9   : > { %v2085_v8 = vsub.f32 %v2048_v27, %v2077_v6 }
 0x3aa   : > { %v2098_v62 = vmul.f32 1.442695, %v2084_v57 }
 0x3ab   : > { %v2100_v9 = vmul.f32 1.442695, %v2085_v8  ;;  %v1394_v18 = vpop.permute.xlu1 %1393 }
 0x3ac   : > { %3517 = vpow2.f32 %v2098_v62  ;;  %v1390_v3 = vpop.permute.xlu0 %1389  ;;  %v1405_v5 = vcombine.low %v4285_v38, %v1394_v18  ;;  %v1406_v24 = vcombine.high %v4285_v38, %v1394_v18 }
 0x3ad   : > { %3519 = vpow2.f32 %v2094_v63  ;;  %v4508_v10 = vpop.eup %3513 }
 0x3ae   : > { %3521 = vpow2.f32 %v2096_v7  ;;  %v4510_v11 = vpop.eup %3515  ;;  %v2111_v12 = vsel %vm1685_vm2, %v4508_v10, 0.0  ;;  %v1413_v32 = vrot.slane %v1405_v5, %v4291_v52 }
 0x3af   : > { %3523 = vpow2.f32 %v2100_v9  ;;  %v2108_v14 = vsel %vm1685_vm2, %v4510_v11, 0.0  ;;  %v1396_v19 = vpop.permute.xlu1 %1395 }
 0x3b0   : > { %v1473_v20 = vcombine.low %v4486_v39, %v1396_v19  ;;  %v1474_v23 = vcombine.high %v4486_v39, %v1396_v19 }
 0x3b2   : > { %v1481_v34 = vrot.slane %v1473_v20, %v4291_v52  ;;  %v1488_v37 = vrot.slane %v1474_v23, %v4291_v52 }
 0x3b4   : > { %1401 = vrot.lane.b32.xlu1 %v4486_v39, %s3880_s3 }
 0x3b9   : > { %v4514_v13 = vpop.eup %3517 }
 0x3ba   : > { %1399 = vrot.lane.b32.xlu0 %v4285_v38, %s3880_s3  ;;  %v4518_v15 = vpop.eup %3519  ;;  %v2120_v16 = vsel %vm1685_vm2, %v4514_v13, 0.0  ;;  %v1420_v38 = vrot.slane %v1406_v24, %v4291_v52  ;;  %s2905_s3 = scalar_lea.sflag [#allocation4], %s4199_s22 }
 0x3bb   : > { %v2114_v21 = vsel %vm1685_vm2, %v4518_v15, 0.0  ;;  %v4524_v22 = vpop.eup %3521 }
 0x3bc   : > { %v2117_v17 = vsel %vm1685_vm2, %v4524_v22, 0.0  ;;  %v4528_v25 = vpop.eup %3523 }
 0x3bd   : > { %v2123_v26 = vsel %vm1685_vm2, %v4528_v25, 0.0 }
 0x3d8   : > { %2112 = vadd.xlane.f32.xlu1 %v2111_v12 }
 0x3d9   : > { %2109 = vadd.xlane.f32.xlu0 %v2108_v14 }
 0x3dc   : > { %2121 = vadd.xlane.f32.xlu1 %v2120_v16 }
 0x3dd   : > { %2115 = vadd.xlane.f32.xlu0 %v2114_v21 }
 0x3e1   : > { %2118 = vadd.xlane.f32.xlu0 %v2117_v17 }
 0x3e5   : > { %2124 = vadd.xlane.f32.xlu0 %v2123_v26 }
 0x42c   : > { %v2104_v4 = vpop.xlane.xlu1 %2103 }
 0x42d   : > { %v2107_v2 = vpop.xlane.xlu0 %2106 }
 0x42e   : > { %3525 = vrcp.f32 %v2107_v2 }
 0x42f   : > { %3527 = vrcp.f32 %v2104_v4 }
 0x430   : > { %v1402_v27 = vpop.permute.xlu1 %1401 }
 0x431   : > { %v1489_v28 = vcombine.low %v1390_v3, %v1402_v27  ;;  %v1490_v29 = vcombine.high %v1390_v3, %v1402_v27  ;;  %v1400_v30 = vpop.permute.xlu0 %1399 }
 0x432   : > { %v1421_v35 = vcombine.low %v4492_v41, %v1400_v30  ;;  %v1422_v36 = vcombine.high %v4492_v41, %v1400_v30 }
 0x433   : > { %v1497_v42 = vrot.slane %v1489_v28, %v4291_v52  ;;  %v1504_v39 = vrot.slane %v1490_v29, %v4291_v52 }
 0x434   : > { %v1429_v43 = vrot.slane %v1421_v35, %v4291_v52  ;;  %v1436_v44 = vrot.slane %v1422_v36, %v4291_v52 }
 0x435   : > { %v1505_v45 = vcombine.low %v1481_v34, %v1497_v42  ;;  %v1506_v46 = vcombine.high %v1481_v34, %v1497_v42  ;;  %v1521_v47 = vcombine.low %v1488_v37, %v1504_v39  ;;  %v1522_v48 = vcombine.high %v1488_v37, %v1504_v39 }
 0x436   : > { %v1437_v33 = vcombine.low %v1413_v32, %v1429_v43  ;;  %v1438_v41 = vcombine.high %v1413_v32, %v1429_v43  ;;  %v1453_v49 = vcombine.low %v1420_v38, %v1436_v44  ;;  %v1454_v50 = vcombine.high %v1420_v38, %v1436_v44 }
 0x437   : > { %v1513_v51 = vrot.slane %v1505_v45, %v4293_v59  ;;  %v1520_v53 = vrot.slane %v1506_v46, %v4293_v59  ;;  %v1529_v54 = vrot.slane %v1521_v47, %v4293_v59  ;;  %v1536_v55 = vrot.slane %v1522_v48, %v4293_v59 }
 0x438   : > { %v1445_v56 = vrot.slane %v1437_v33, %v4293_v59  ;;  %v1452_v57 = vrot.slane %v1438_v41, %v4293_v59  ;;  %v1461_v58 = vrot.slane %v1453_v49, %v4293_v59  ;;  %v1468_v60 = vrot.slane %v1454_v50, %v4293_v59 }
 0x439   : > { %v1609_v61 = vcombine.low %v1513_v51, %v1520_v53  ;;  %v3142_v62 = vcombine.high %v1513_v51, %v1520_v53  ;;  %v1625_v63 = vcombine.low %v1529_v54, %v1536_v55  ;;  %v3143_v1 = vcombine.high %v1529_v54, %v1536_v55 }
 0x43a   : > { %v1541_v6 = vcombine.low %v1445_v56, %v1452_v57  ;;  %v3140_v7 = vcombine.high %v1445_v56, %v1452_v57  ;;  %v1557_v8 = vcombine.low %v1461_v58, %v1468_v60  ;;  %v3141_v9 = vcombine.high %v1461_v58, %v1468_v60 }
 0x43b   : > { %v1616_v12 = vrot.slane %v1609_v61, %v4291_v52  ;;  %v1624_v14 = vrot.slane %v3142_v62, %v4291_v52  ;;  %v1632_v16 = vrot.slane %v1625_v63, %v4291_v52  ;;  %v1640_v21 = vrot.slane %v3143_v1, %v4291_v52  ;;  %v3526_v24 = vpop.eup %3525 }
 0x43c   : > { %v1548_v17 = vrot.slane %v1541_v6, %v4291_v52  ;;  %v1556_v26 = vrot.slane %v3140_v7, %v4291_v52  ;;  %v1564_v18 = vrot.slane %v1557_v8, %v4291_v52  ;;  %v1572_v19 = vrot.slane %v3141_v9, %v4291_v52  ;;  %v3528_v29 = vpop.eup %3527 }
 0x43d   : > { %v1641_v3 = vcombine.low %v1616_v12, %v1624_v14  ;;  %v1657_v4 = vcombine.low %v1632_v16, %v1640_v21  ;;  %v2135_v37 = vmul.f32 %v3526_v24, %v4496_v40  ;;  %v2134_v39 = vmul.f32 %v3528_v29, %v4494_v31 }
 0x43e   : > { %v1573_v2 = vcombine.low %v1548_v17, %v1556_v26  ;;  %v1589_v5 = vcombine.low %v1564_v18, %v1572_v19  ;;  %v1642_v41 = vcombine.high %v1616_v12, %v1624_v14  ;;  %v1658_v49 = vcombine.high %v1632_v16, %v1640_v21 }
 0x43f   : > { %v1649_v20 = vrot.slane %v1641_v3, %v4293_v59  ;;  %v1665_v23 = vrot.slane %v1657_v4, %v4293_v59  ;;  %v2143_v46 = vpack.c.bf16 %v2135_v37, %v2135_v37  ;;  %v2142_v47 = vpack.c.bf16 %v2134_v39, %v2134_v39 }
 0x440   : > { %v1581_v27 = vrot.slane %v1573_v2, %v4293_v59  ;;  %v1597_v28 = vrot.slane %v1589_v5, %v4293_v59  ;;  %v1574_v50 = vcombine.high %v1548_v17, %v1556_v26  ;;  %v1590_v51 = vcombine.high %v1564_v18, %v1572_v19 }
 0x441   : > { %v1673_v30 = vcombine.low %v1649_v20, %v1665_v23  ;;  %v1674_v32 = vcombine.high %v1649_v20, %v1665_v23  ;;  %v1656_v54 = vrot.slane %v1642_v41, %v4293_v59  ;;  %v1672_v55 = vrot.slane %v1658_v49, %v4293_v59 }
 0x442   : > { %v1605_v34 = vcombine.low %v1581_v27, %v1597_v28  ;;  %v1606_v35 = vcombine.high %v1581_v27, %v1597_v28  ;;  %v1588_v56 = vrot.slane %v1574_v50, %v4293_v59  ;;  %v1604_v57 = vrot.slane %v1590_v51, %v4293_v59 }
 0x443   : > { %v1678_v36 = vpack.c.bf16 %v1673_v30, %v1673_v30  ;;  %v1680_v43 = vpack.c.bf16 %v1674_v32, %v1674_v32  ;;  %v1675_v61 = vcombine.low %v1656_v54, %v1672_v55  ;;  %v1676_v19 = vcombine.high %v1656_v54, %v1672_v55 }
 0x444   : > { %v1677_v42 = vpack.c.bf16 %v1605_v34, %v1605_v34  ;;  %v1679_v45 = vpack.c.bf16 %v1606_v35, %v1606_v35  ;;  %v1607_v62 = vcombine.low %v1588_v56, %v1604_v57  ;;  %v1608_v18 = vcombine.high %v1588_v56, %v1604_v57 }
 0x445   : > { %v2201_v38 = vsel %vm2153_vm3, %v1678_v36, 0  ;;  %v2293_v40 = vsel %vm2153_vm3, %v1680_v43, 0  ;;  %v1682_v8 = vpack.c.bf16 %v1675_v61, %v1675_v61  ;;  %v1684_v2 = vpack.c.bf16 %v1676_v19, %v1676_v19 }
 0x446   : > { %v2155_v44 = vsel %vm2153_vm3, %v1677_v42, 0  ;;  %3304 = vmatpush3.bf16.msra.mxu0 %v2201_v38  ;;  %v2247_v31 = vsel %vm2153_vm3, %v1679_v45, 0  ;;  %v1681_v12 = vpack.c.bf16 %v1607_v62, %v1607_v62  ;;  %v1683_v4 = vpack.c.bf16 %v1608_v18, %v1608_v18 }
 0x447   : > { %3298 = vmatpush3.bf16.msra.mxu1 %v2155_v44  ;;  %3315 = vmatprep.subr.bf16.mxu0 %v3876_v0  ;;  %v2385_v17 = vsel %vm2153_vm3, %v1682_v8, 0  ;;  %v2477_v28 = vsel %vm2153_vm3, %v1684_v2, 0 }
 0x448   : > { %3309 = vmatprep.subr.bf16.mxu1 %v3876_v0  ;;  %v2339_v26 = vsel %vm2153_vm3, %v1681_v12, 0  ;;  %v2431_v27 = vsel %vm2153_vm3, %v1683_v4, 0 }
 0x449   : > { %3306 = vmatmul.mubr.msk.bf16.vlgmr.msra.gmra.mxu0 %vm1685_vm2, %v2143_v46 }
 0x44a   : > { %3300 = vmatmul.mubr.msk.bf16.vlgmr.msra.gmra.mxu1 %vm1685_vm2, %v2142_v47  ;;  %3316 = vmatpush3.bf16.msra.mxu0 %v2293_v40 }
 0x44b   : > { %3310 = vmatpush3.bf16.msra.mxu1 %v2247_v31  ;;  %3311 = vmatprep.mubr.msk.bf16.mxu1 %vm3877_vm0, %v3876_v0 }
 0x44c   : > { %3317 = vmatprep.mubr.msk.bf16.mxu0 %vm3877_vm0, %v3876_v0  ;;  %3321 = vmatprep.subr.bf16.mxu1 %v3876_v0 }
 0x44d   : > { %3327 = vmatprep.subr.bf16.mxu0 %v3876_v0 }
 0x461   : > { %v2113_v48 = vpop.xlane.xlu1 %2112 }
 0x462   : > { %3529 = vrcp.f32 %v2113_v48  ;;  %v2110_v33 = vpop.xlane.xlu0 %2109 }
 0x463   : > { %3531 = vrcp.f32 %v2110_v33 }
 0x465   : > { %v2122_v60 = vpop.xlane.xlu1 %2121 }
 0x466   : > { %v2116_v53 = vpop.xlane.xlu0 %2115 }
 0x467   : > { %3533 = vrcp.f32 %v2116_v53 }
 0x46a   : > { %v2119_v58 = vpop.xlane.xlu0 %2118 }
 0x46b   : > { %3535 = vrcp.f32 %v2119_v58 }
 0x46c   : > { %3537 = vrcp.f32 %v2122_v60 }
 0x46e   : > { %v2125_v63 = vpop.xlane.xlu0 %2124 }
 0x46f   : > { %v3530_v1 = vpop.eup %3529  ;;  %3539 = vrcp.f32 %v2125_v63 }
 0x470   : > { %v3532_v6 = vpop.eup %3531  ;;  %v2137_v7 = vmul.f32 %v3530_v1, %v4508_v10 }
 0x471   : > { %v2136_v9 = vmul.f32 %v3532_v6, %v4510_v11 }
 0x472   : > { %v2145_v14 = vpack.c.bf16 %v2137_v7, %v2137_v7 }
 0x473   : > { %v2144_v16 = vpack.c.bf16 %v2136_v9, %v2136_v9 }
 0x474   : > { %v3534_v21 = vpop.eup %3533  ;;  %3318 = vmatmul.mubr.msk.bf16.vlgmr.msra.gmra.mxu0 %vm1685_vm2, %v2145_v14 }
 0x475   : > { %3312 = vmatmul.mubr.msk.bf16.vlgmr.msra.gmra.mxu1 %vm1685_vm2, %v2144_v16  ;;  %3328 = vmatpush3.bf16.msra.mxu0 %v2385_v17  ;;  %v2138_v10 = vmul.f32 %v3534_v21, %v4518_v15 }
 0x476   : > { %3322 = vmatpush3.bf16.msra.mxu1 %v2339_v26  ;;  %3323 = vmatprep.mubr.msk.bf16.mxu1 %vm3877_vm0, %v3876_v0 }
 0x477   : > { %3329 = vmatprep.mubr.msk.bf16.mxu0 %vm3877_vm0, %v3876_v0  ;;  %3333 = vmatprep.subr.bf16.mxu1 %v3876_v0  ;;  %v2146_v20 = vpack.c.bf16 %v2138_v10, %v2138_v10 }
 0x478   : > { %v3536_v11 = vpop.eup %3535  ;;  %3339 = vmatprep.subr.bf16.mxu0 %v3876_v0 }
 0x479   : > { %v2139_v3 = vmul.f32 %v3536_v11, %v4524_v22  ;;  %v3538_v5 = vpop.eup %3537 }
 0x47a   : > { %v2140_v15 = vmul.f32 %v3538_v5, %v4514_v13 }
 0x47b   : > { %v2147_v23 = vpack.c.bf16 %v2139_v3, %v2139_v3 }
 0x47c   : > { %v3540_v24 = vpop.eup %3539  ;;  %v2148_v29 = vpack.c.bf16 %v2140_v15, %v2140_v15 }
 0x47d   : > { %3324 = vmatmul.mubr.msk.bf16.vlgmr.msra.gmra.mxu1 %vm1685_vm2, %v2146_v20  ;;  %3330 = vmatmul.mubr.msk.bf16.vlgmr.msra.gmra.mxu0 %vm1685_vm2, %v2147_v23  ;;  %v2141_v22 = vmul.f32 %v3540_v24, %v4528_v25 }
 0x47e   : > { %3334 = vmatpush3.bf16.msra.mxu1 %v2431_v27  ;;  %3340 = vmatpush3.bf16.msra.mxu0 %v2477_v28 }
 0x47f   : > { %3335 = vmatprep.mubr.msk.bf16.mxu1 %vm3877_vm0, %v3876_v0  ;;  %3341 = vmatprep.mubr.msk.bf16.mxu0 %vm3877_vm0, %v3876_v0  ;;  %v2149_v30 = vpack.c.bf16 %v2141_v22, %v2141_v22 }
 0x480   : > { %3345 = vmatprep.subr.bf16.mxu1 %v3876_v0 }
 0x485   : > { %3336 = vmatmul.mubr.msk.bf16.vlgmr.msra.gmra.mxu1 %vm1685_vm2, %v2148_v29  ;;  %3342 = vmatmul.mubr.msk.bf16.vlgmr.msra.gmra.mxu0 %vm1685_vm2, %v2149_v30 }
 0x486   : > { %3349 = vmatprep.mubr.msk.bf16.mxu1 %vm3877_vm0, %v3876_v0 }
 0x509   : > { %v2237_v32 = vpop.f32.mrf.mxu0 }
 0x50a   : > { %v2191_v34 = vpop.f32.mrf.mxu1 }
 0x50b   : > { %v3307_v35 = vpop.f32.mrf.mxu0 }
 0x50c   : > { %v3301_v36 = vpop.f32.mrf.mxu1 }
 0x50d   : > { %v2240_v37 = vpop.f32.mrf.mxu0 }
 0x50e   : > { %v2194_v42 = vpop.f32.mrf.mxu1 }
 0x50f   : > { %v3308_v13 = vpop.f32.mrf.mxu0 }
 0x510   : > { %v3302_v39 = vpop.f32.mrf.mxu1 }
 0x534   : > { %v2329_v25 = vpop.f32.mrf.mxu0 }
 0x535   : > { %v2283_v38 = vpop.f32.mrf.mxu1 }
 0x536   : > { %v3319_v43 = vpop.f32.mrf.mxu0 }
 0x537   : > { %v3313_v44 = vpop.f32.mrf.mxu1 }
 0x538   : > { %v2332_v45 = vpop.f32.mrf.mxu0 }
 0x539   : > { %v2286_v46 = vpop.f32.mrf.mxu1 }
 0x53a   : > { %v3320_v47 = vpop.f32.mrf.mxu0 }
 0x53b   : > { %v3314_v40 = vpop.f32.mrf.mxu1 }
 0x53c   : > { %v3507_v40 = vld [vmem:[%s4719_s9 + $0x8] sm:$0xff]  }
 0x53d   : > { %v2375_v31 = vpop.f32.mrf.mxu1  ;;  %v2421_v48 = vpop.f32.mrf.mxu0  ;;  %3346 = vmatpush3.bf16.msra.mxu1 %v3507_v40 }
 0x53e   : > { %v2519_v51 = vcombine.low %v2191_v34, %v2375_v31  ;;  %v2520_v53 = vcombine.high %v2191_v34, %v2375_v31  ;;  %v2587_v56 = vcombine.low %v2237_v32, %v2421_v48  ;;  %v2588_v57 = vcombine.high %v2237_v32, %v2421_v48  ;;  %3347 = vmatprep.subr.bf16.mxu1 %v3876_v0  ;;  %v3508_v0 = vld [vmem:[%s4719_s9] sm:$0xff]  }
 0x53f   : > { %v3325_v33 = vpop.f32.mrf.mxu1  ;;  %v3331_v41 = vpop.f32.mrf.mxu0 }
 0x540   : > { %v2527_v6 = vrot.slane %v2519_v51, %v4291_v52  ;;  %v2534_v7 = vrot.slane %v2520_v53, %v4291_v52  ;;  %v2595_v17 = vrot.slane %v2587_v56, %v4291_v52  ;;  %v2602_v26 = vrot.slane %v2588_v57, %v4291_v52 }
 0x541   : > { %v2378_v49 = vpop.f32.mrf.mxu1  ;;  %v2424_v50 = vpop.f32.mrf.mxu0  ;;  %3348 = vmatpush3.bf16.msra.mxu1 %v3508_v0 }
 0x543   : > { %v3326_v54 = vpop.f32.mrf.mxu1  ;;  %v3332_v55 = vpop.f32.mrf.mxu0 }
 0x545   : > { %v2467_v58 = vpop.f32.mrf.mxu1  ;;  %v2513_v60 = vpop.f32.mrf.mxu0 }
 0x546   : > { %v2535_v61 = vcombine.low %v2283_v38, %v2467_v58  ;;  %v2536_v62 = vcombine.high %v2283_v38, %v2467_v58  ;;  %v2603_v63 = vcombine.low %v2329_v25, %v2513_v60  ;;  %v2604_v1 = vcombine.high %v2329_v25, %v2513_v60 }
 0x547   : > { %v3337_v8 = vpop.f32.mrf.mxu1  ;;  %v3343_v9 = vpop.f32.mrf.mxu0 }
 0x548   : > { %v2543_v12 = vrot.slane %v2535_v61, %v4291_v52  ;;  %v2550_v14 = vrot.slane %v2536_v62, %v4291_v52  ;;  %v2611_v16 = vrot.slane %v2603_v63, %v4291_v52  ;;  %v2618_v21 = vrot.slane %v2604_v1, %v4291_v52 }
 0x549   : > { %v2470_v18 = vpop.f32.mrf.mxu1  ;;  %v2516_v19 = vpop.f32.mrf.mxu0 }
 0x54a   : > { %v2551_v10 = vcombine.low %v2527_v6, %v2543_v12  ;;  %v2552_v11 = vcombine.high %v2527_v6, %v2543_v12  ;;  %v2567_v3 = vcombine.low %v2534_v7, %v2550_v14  ;;  %v2568_v4 = vcombine.high %v2534_v7, %v2550_v14 }
 0x54b   : > { %v2619_v2 = vcombine.low %v2595_v17, %v2611_v16  ;;  %v2620_v5 = vcombine.high %v2595_v17, %v2611_v16  ;;  %v2635_v20 = vcombine.low %v2602_v26, %v2618_v21  ;;  %v2636_v23 = vcombine.high %v2602_v26, %v2618_v21  ;;  %v3338_v24 = vpop.f32.mrf.mxu1  ;;  %v3344_v27 = vpop.f32.mrf.mxu0 }
 0x54c   : > { %v2559_v28 = vrot.slane %v2551_v10, %v4293_v59  ;;  %v2566_v15 = vrot.slane %v2552_v11, %v4293_v59  ;;  %v2575_v22 = vrot.slane %v2567_v3, %v4293_v59  ;;  %v2582_v29 = vrot.slane %v2568_v4, %v4293_v59 }
 0x54d   : > { %v2627_v30 = vrot.slane %v2619_v2, %v4293_v59  ;;  %v2634_v32 = vrot.slane %v2620_v5, %v4293_v59  ;;  %v2643_v34 = vrot.slane %v2635_v20, %v4293_v59  ;;  %v2650_v35 = vrot.slane %v2636_v23, %v4293_v59 }
 0x54e   : > { %v2655_v36 = vcombine.low %v2559_v28, %v2566_v15  ;;  %v3160_v37 = vcombine.high %v2559_v28, %v2566_v15  ;;  %v2671_v42 = vcombine.low %v2575_v22, %v2582_v29  ;;  %v3161_v13 = vcombine.high %v2575_v22, %v2582_v29 }
 0x54f   : > { %v2723_v39 = vcombine.low %v2627_v30, %v2634_v32  ;;  %v3162_v25 = vcombine.high %v2627_v30, %v2634_v32  ;;  %v2739_v38 = vcombine.low %v2643_v34, %v2650_v35  ;;  %v3163_v43 = vcombine.high %v2643_v34, %v2650_v35  ;;  %v3164_v32 = vld [vmem:[%s4720_s10] ss:$0 sm:$0xff] }
 0x550   : > { %v2662_v44 = vrot.slane %v2655_v36, %v4291_v52  ;;  %v2670_v45 = vrot.slane %v3160_v37, %v4291_v52  ;;  %v2678_v46 = vrot.slane %v2671_v42, %v4291_v52  ;;  %v2686_v47 = vrot.slane %v3161_v13, %v4291_v52 }
 0x551   : > { %v2730_v31 = vrot.slane %v2723_v39, %v4291_v52  ;;  %v2738_v48 = vrot.slane %v3162_v25, %v4291_v52  ;;  %v2746_v33 = vrot.slane %v2739_v38, %v4291_v52  ;;  %v2754_v41 = vrot.slane %v3163_v43, %v4291_v52 }
 0x552   : > { %v2688_v49 = vcombine.high %v2662_v44, %v2670_v45  ;;  %v2704_v50 = vcombine.high %v2678_v46, %v2686_v47  ;;  %v2687_v51 = vcombine.low %v2662_v44, %v2670_v45  ;;  %v2703_v53 = vcombine.low %v2678_v46, %v2686_v47 }
 0x553   : > { %v2756_v54 = vcombine.high %v2730_v31, %v2738_v48  ;;  %v2772_v55 = vcombine.high %v2746_v33, %v2754_v41  ;;  %v2755_v56 = vcombine.low %v2730_v31, %v2738_v48  ;;  %v2771_v57 = vcombine.low %v2746_v33, %v2754_v41 }
 0x554   : > { %v2702_v58 = vrot.slane %v2688_v49, %v4293_v59  ;;  %v2718_v60 = vrot.slane %v2704_v50, %v4293_v59  ;;  %v2695_v61 = vrot.slane %v2687_v51, %v4293_v59  ;;  %v2711_v62 = vrot.slane %v2703_v53, %v4293_v59 }
 0x555   : > { %v2770_v52 = vrot.slane %v2756_v54, %v4293_v59  ;;  %v2786_v63 = vrot.slane %v2772_v55, %v4293_v59  ;;  %v2763_v1 = vrot.slane %v2755_v56, %v4293_v59  ;;  %v2779_v6 = vrot.slane %v2771_v57, %v4293_v59 }
 0x556   : > { %v2721_v7 = vcombine.low %v2702_v58, %v2718_v60  ;;  %v2719_v8 = vcombine.low %v2695_v61, %v2711_v62  ;;  %v2720_v9 = vcombine.high %v2695_v61, %v2711_v62  ;;  %v2722_v26 = vcombine.high %v2702_v58, %v2718_v60 }
 0x557   : > { %v2789_v12 = vcombine.low %v2770_v52, %v2786_v63  ;;  %v2788_v14 = vcombine.high %v2763_v1, %v2779_v6  ;;  %v2787_v16 = vcombine.low %v2763_v1, %v2779_v6  ;;  %v2790_v18 = vcombine.high %v2770_v52, %v2786_v63 }
 0x559   : > { %v3491_v21 = vpack.i.bf16 %v2789_v12, %v2721_v7  ;;  %v3486_v17 = vpack.i.bf16 %v2788_v14, %v2720_v9  ;;  %v3496_v59 = vpack.i.bf16 %v2790_v18, %v2722_v26 }
 0x55b   : > { %3492 = vrot.lane.b32.xlu0 %v3491_v21, %s3883_s26  ;;  %3487 = vrot.lane.b32.xlu1 %v3486_v17, %s3884_s12 }
 0x55f   : > { %3497 = vrot.lane.b32.xlu1 %v3496_v59, %s3885_s15 }
 0x5cd   : > { %v3493_v19 = vpop.permute.xlu0 %3492  ;;  %v3488_v10 = vpop.permute.xlu1 %3487 }
 0x5ce   : > { %v3490_v11 = vunpack.i.h.bf16 %v3488_v10  ;;  %v3489_v3 = vunpack.i.l.bf16 %v3488_v10  ;;  %v3495_v4 = vunpack.i.h.bf16 %v3493_v19  ;;  %v3494_v2 = vunpack.i.l.bf16 %v3493_v19 }
 0x5d0   : > { %v2815_v5 = vsel %vm1685_vm2, %v2719_v8, %v3489_v3  ;;  %v2816_v20 = vsel %vm1685_vm2, %v2787_v16, %v3490_v11 }
 0x5d1   : > { %v3498_v23 = vpop.permute.xlu1 %3497  ;;  %v2818_v28 = vsel %vm2817_vm4, %v2815_v5, %v3494_v2  ;;  %v2819_v15 = vsel %vm2817_vm4, %v2816_v20, %v3495_v4 }
 0x5d2   : > { %v3500_v24 = vunpack.i.h.bf16 %v3498_v23  ;;  %v3499_v27 = vunpack.i.l.bf16 %v3498_v23 }
 0x5d4   : > { %v2821_v22 = vsel %vm2820_vm5, %v2818_v28, %v3499_v27  ;;  %v2822_v29 = vsel %vm2820_vm5, %v2819_v15, %v3500_v24 }
 0x5d5   : > { %v2823_v30 = vpack.c.bf16 %v2822_v29, %v2821_v22 }
 0x5d7   : > { %3350 = vmatmul.mubr.msk.bf16.vlgmr.msra.gmra.mxu1 %vm594_vm1, %v2823_v30 }
 0x697   : > { %v2884_v34 = vpop.f32.mrf.mxu1 }
 0x698   : > { %v2885_v35 = vadd.f32 %v3164_v32, %v2884_v34 }
 0x699   : > { %v3351_v36 = vpop.f32.mrf.mxu1 }
 0x69a   : > { %v2891_v37 = vmax.f32 %v2885_v35, 0.0 }
 0x69b   : > { %v2887_v42 = vpop.f32.mrf.mxu1 }
 0x69c   : > { %v3178_v13 = vpack.c.bf16 %v2891_v37, %v2891_v37  ;;  %v2888_v39 = vadd.f32 %v3164_v32, %v2887_v42 }
 0x69d   : > { %v3352_v25 = vpop.f32.mrf.mxu1 }
 0x69e   : > { %2902 = vst.msk [vmem:[%s562_s21] sm:$0xf] %vm2901_vm6, %v3178_v13  ;;  %v2892_v38 = vmax.f32 %v2888_v39, 0.0 }
 0x6a0   : > { %v3179_v43 = vpack.c.bf16 %v2892_v38, %v2892_v38 }
 0x6a2   : > { %2903 = vst.msk [vmem:[%s562_s21 + $0x4] sm:$0xf] %vm2901_vm6, %v3179_v43 }
 0x6a3   : > { %3794 = shalt.err (!%p3791_p6)
}
 0x6a4   : > { %s3795_s1 = scalar_lea.hbm %s4665_s25, 128  ;;  %s3799_s15 = scalar_lea.hbm %s4774_s29, 256 }
 0x6a5   : > { %p3796_p13 = scmp.ne.s32.totalorder %s4665_s25, %s3795_s1  ;;  %p3800_p9 = scmp.lt.s32.totalorder %s4665_s25, %s4774_s29 }
 0x6a6   : > { %p3801_p0 = scmp.lt.s32.totalorder %s3799_s15, %s3795_s1 }
 0x6a7   : > { %p3797_p8 = pnand %p3796_p13, %p4775_p12 }
 0x6a8   : > { %p3802_p2 = por %p3801_p0, %p3800_p9 }
 0x6a9   : > { %p3798_p7 = pneg %p3797_p8 }
 0x6ab   : > { %p3803_p10 = pnand %p3802_p2, %p3798_p7 }
 0x6ad   : > { %3806 = shalt.err (!%p3803_p10)
}
 0x6ae   : > { %s3887_s30 = smov 64   ;;  %s3888_s27 = smov 4  }
 0x6af   : > { %3383 = dma.vmem_to_hbm [thread:$0]  (%p4775_p12), %s4667_s24, 128, %s4665_s25, %s2905_s3, %s3887_s30, %s3887_s30, %s3888_s27  }
 0x6b0 PF: > { %s4776_s21 = sld [smem:[#allocation24_spill]] }
 0x6b1   : > { %s4777_s28 = sld [smem:[#allocation28_spill]] }
 0x6b2   : > { %s4778_s17 = sld [smem:[#allocation25_spill]] }
 0x6b6   : > { %s2933_s20 = sand.u32 1, %s4776_s21  }
 0x6b7   : > { %p4779_p4 = scmp.ne.s32.totalorder %s4777_s28, 0  ;;  %s2934_s16 = scalar_lea.sflag [#allocation4], %s2933_s20 }
 0x6b8   : > { %p4780_p3 = scmp.ge.s32.totalorder %s4778_s17, 2 }
 0x6ba   : > { %p3415_p1 = pnand %p4780_p3, %p4779_p4 }
 0x6bc   : > { %p3416_p5 = pneg %p3415_p1 }
 0x6be   : > { %3844 = dma.done.wait (%p3416_p5), %s2934_s16, 128  }
 0x6bf   : > { %3846 = vsyncadd (%p3416_p5), %s2934_s16, 4294967168  ;;  %s4781_s20 = sld [smem:[#allocation26_spill]]  ;;  %s4783_s17 = smov %s3853_s18 }
 0x6c0   : > { %s4782_s23 = sld [smem:[#allocation27_spill]]  ;;  %s4784_s18 = smov %s3857_s19 }
 0x6c5   : > { %p30_p11 = scmp.ge.s32.totalorder %s4781_s20, 4  }
 0x6c6   : > { %s4785_s19 = smov %s4782_s23 }
 0x6c7   :  { %32 = sbr.rel (!%p30_p11) target bundleno = 16 (0x10), region = 157 }
 0x6cc   :  { %2939 = vsyncpa [#allocation3], 1 }
 0x6cd   :  { %2941 = vsyncpa [#allocation3 + $0x1], 1 }
 0x6ce   :  { %2942 = vsyncpa [#allocation6], 1 }
 0x6cf   :  { %2944 = vsyncpa [#allocation6 + $0x1], 1 }
 0x6d0   :  { %2945 = vsyncpa [#allocation9], 1 }
 0x6d1   :  { %2946 = vsyncpa [#allocation12], 1 }
 0x6d2   :  { %2947 = vsyncpa [#allocation15], 1 }
 0x6d3   :  { %2948 = vsyncpa [#allocation4], 1 }
 0x6d4   :  { %2950 = vsyncpa [#allocation4 + $0x1], 1 }

</bundles_post_ra>
